<compile_context>
chip_gen: v7x
topology: tpu7x:2x2x1
jax: 0.10.0
libtpu: 0.0.40
codegen_flags: <defaults>
</compile_context>

<pallas_src>
import math
import jax
import jax.numpy as jnp
from jax.experimental import pallas as pl
from jax.experimental.pallas import tpu as pltpu

# ------------- tiny synthetic config (stands in for xlm-roberta-large) -------
VOCAB      = 128
SEQ        = 8
HIDDEN     = 128          # lane-dense (multiple of 128)
NHEADS     = 2
HEAD_DIM   = HIDDEN // NHEADS
FFN        = 256          # lane-dense (multiple of 128)
LAYERS     = 2
NUM_LABELS = 3
BATCH      = 2
LN_EPS     = 1e-5


def _layernorm(x, gamma, beta):
    mu  = jnp.mean(x, axis=-1, keepdims=True)
    var = jnp.mean((x - mu) ** 2, axis=-1, keepdims=True)
    return (x - mu) * jax.lax.rsqrt(var + LN_EPS) * gamma + beta


# -------------------- Pallas kernel: fused encoder + classifier ---------------
def fused_encoder_kernel(x0_ref, mask_ref,
                         wqkv_ref, bqkv_ref, wo_ref, bo_ref,
                         g1_ref, be1_ref,
                         w1_ref, bf1_ref, w2_ref, bf2_ref,
                         g2_ref, be2_ref,
                         clsw_ref, clsb_ref,
                         out_ref,
                         x_scr):
    layer = pl.program_id(1)

    # Load this batch row's embeddings into the resident VMEM activation at
    # the first layer step (re-initialized per batch tile).
    @pl.when(layer == 0)
    def _():
        x_scr[...] = x0_ref[0]

    x = x_scr[...]                                   # (S, H) bf16, resident
    # Additive key-padding bias built in-kernel from the (1, S) key mask.
    # Kept in f32 and added AFTER the f32 score accumulation (bf16-safe).
    key_bias = (1.0 - mask_ref[0]) * (-1e9)          # (1, S) f32

    # ---- multi-head self-attention ----
    # Fused QKV projection: one lane-dense (S,H)@(H,3H) matmul + one bias add.
    qkv = (jnp.dot(x, wqkv_ref[0], preferred_element_type=jnp.float32)
           + bqkv_ref[0])                            # (S, 3H) f32
    qkv = qkv.astype(jnp.bfloat16)

    ctx_heads = []
    for h in range(NHEADS):                          # static unroll, toy NHEADS
        q_h = qkv[:, h * HEAD_DIM:(h + 1) * HEAD_DIM]                 # scale folded into Wq
        k_h = qkv[:, HIDDEN + h * HEAD_DIM: HIDDEN + (h + 1) * HEAD_DIM]
        v_h = qkv[:, 2 * HIDDEN + h * HEAD_DIM: 2 * HIDDEN + (h + 1) * HEAD_DIM]

        # scores = q_h @ k_h^T (contract last dims), f32 accumulation
        s = jax.lax.dot_general(q_h, k_h, (((1,), (1,)), ((), ())),
                                preferred_element_type=jnp.float32)   # (S, S)
        s = s + key_bias
        s = s - jnp.max(s, axis=-1, keepdims=True)
        e = jnp.exp(s)
        p = e * pl.reciprocal(jnp.sum(e, axis=-1, keepdims=True), approx=True)
        ctx_heads.append(jnp.dot(p.astype(jnp.bfloat16), v_h,
                                 preferred_element_type=jnp.float32)) # (S, HD)

    ctx = jnp.concatenate(ctx_heads, axis=-1)        # (S, H) f32
    attn = (jnp.dot(ctx.astype(jnp.bfloat16), wo_ref[0],
                    preferred_element_type=jnp.float32)
            + bo_ref[0])                             # single (S,H)@(H,H) O-proj

    y = _layernorm(x.astype(jnp.float32) + attn, g1_ref[0], be1_ref[0])  # post-LN

    # ---- feed-forward ----
    # TODO(synk): HF RoBERTa uses exact (erf) GELU; tanh approximation used here
    # for a guaranteed Mosaic lowering.
    h1 = jax.nn.gelu(
        jnp.dot(y.astype(jnp.bfloat16), w1_ref[0],
                preferred_element_type=jnp.float32) + bf1_ref[0],
        approximate=True)
    ff = (jnp.dot(h1.astype(jnp.bfloat16), w2_ref[0],
                  preferred_element_type=jnp.float32) + bf2_ref[0])
    z = _layernorm(y + ff, g2_ref[0], be2_ref[0])

    x_scr[...] = z.astype(jnp.bfloat16)              # activation stays resident

    # ---- classifier head, fused into the last layer's epilogue ----
    @pl.when(layer == pl.num_programs(1) - 1)
    def _():
        cls = z[0:1, :].astype(jnp.bfloat16)         # CLS row, no one-hot gather
        out_ref[0] = (jnp.dot(cls, clsw_ref[...],
                              preferred_element_type=jnp.float32)
                      + clsb_ref[...])


def run_fused_encoder(x0, key_mask, p):
    def per_batch(shape):
        return pl.BlockSpec((1,) + shape[1:],
                            lambda b, l, _n=len(shape): (b,) + (0,) * (_n - 1))

    def per_layer(shape):
        return pl.BlockSpec((1,) + shape[1:],
                            lambda b, l, _n=len(shape): (l,) + (0,) * (_n - 1))

    def fixed(shape):
        return pl.BlockSpec(shape, lambda b, l, _n=len(shape): (0,) * _n)

    grid_spec = pltpu.PrefetchScalarGridSpec(
        num_scalar_prefetch=0,
        grid=(BATCH, LAYERS),                  # layers innermost: weights stream,
        in_specs=[                             # activation resident per batch tile
            per_batch(x0.shape),               # (B, S, H) bf16 embeddings
            per_batch(key_mask.shape),         # (B, 1, S) f32 key mask
            per_layer(p["wqkv"].shape),        # (L, H, 3H)  bf16
            per_layer(p["bqkv"].shape),        # (L, 1, 3H)  f32
            per_layer(p["wo"].shape),          # (L, H, H)   bf16
            per_layer(p["bo"].shape),          # (L, 1, H)   f32
            per_layer(p["ln1_g"].shape),
            per_layer(p["ln1_b"].shape),
            per_layer(p["w1"].shape),          # (L, H, FFN) bf16
            per_layer(p["b1"].shape),          # (L, 1, FFN) f32
            per_layer(p["w2"].shape),          # (L, FFN, H) bf16
            per_layer(p["b2"].shape),          # (L, 1, H)   f32
            per_layer(p["ln2_g"].shape),
            per_layer(p["ln2_b"].shape),
            fixed(p["cls_w"].shape),           # (H, 3) bf16
            fixed(p["cls_b"].shape),           # (1, 3) f32
        ],
        # Per-batch logits block; constant across the (sequential) layer axis so
        # it stays resident and is written once, in the last layer's epilogue.
        out_specs=pl.BlockSpec((1, 1, NUM_LABELS), lambda b, l: (b, 0, 0)),
        scratch_shapes=[pltpu.VMEM((SEQ, HIDDEN), jnp.bfloat16)],
    )
    out = pl.pallas_call(
        fused_encoder_kernel,
        out_shape=jax.ShapeDtypeStruct((BATCH, 1, NUM_LABELS), jnp.float32),
        grid_spec=grid_spec,
        compiler_params=pltpu.CompilerParams(
            dimension_semantics=("parallel", "arbitrary"),
            vmem_limit_bytes=64 * 1024 * 1024),
    )(x0, key_mask,
      p["wqkv"], p["bqkv"], p["wo"], p["bo"],
      p["ln1_g"], p["ln1_b"],
      p["w1"], p["b1"], p["w2"], p["b2"],
      p["ln2_g"], p["ln2_b"],
      p["cls_w"], p["cls_b"])
    return out[:, 0, :]                              # (B, NUM_LABELS)


# ------------------------- parameter init (deterministic) ---------------------
def init_params(key):
    def nrm(k, shape, scale=0.02, dtype=jnp.float32):
        return (scale * jax.random.normal(k, shape)).astype(dtype)

    keys = jax.random.split(key, 8)
    inv_sqrt_hd = 1.0 / math.sqrt(HEAD_DIM)

    # Fused, lane-dense QKV weight: columns ordered [Q (all heads) | K | V].
    wqkv = nrm(keys[3], (LAYERS, HIDDEN, 3 * HIDDEN))
    # Fold the 1/sqrt(head_dim) attention scale into the Q columns at init time
    # (the Q bias is zero, so no bias scaling is needed).
    wqkv = wqkv.at[:, :, :HIDDEN].multiply(inv_sqrt_hd)

    return {
        "word_emb": nrm(keys[0], (VOCAB, HIDDEN)),
        "pos_emb":  nrm(keys[1], (SEQ, HIDDEN)),
        "emb_ln_g": jnp.ones((HIDDEN,), jnp.float32),
        "emb_ln_b": jnp.zeros((HIDDEN,), jnp.float32),
        # bf16 matmul weights (f32 accumulation in-kernel); biases / LN in f32.
        "cls_w":    nrm(keys[2], (HIDDEN, NUM_LABELS), dtype=jnp.bfloat16),
        "cls_b":    jnp.zeros((1, NUM_LABELS), jnp.float32),
        "wqkv":     wqkv.astype(jnp.bfloat16),
        "bqkv":     jnp.zeros((LAYERS, 1, 3 * HIDDEN), jnp.float32),
        "wo":       nrm(keys[4], (LAYERS, HIDDEN, HIDDEN), dtype=jnp.bfloat16),
        "bo":       jnp.zeros((LAYERS, 1, HIDDEN), jnp.float32),
        "ln1_g":    jnp.ones((LAYERS, 1, HIDDEN), jnp.float32),
        "ln1_b":    jnp.zeros((LAYERS, 1, HIDDEN), jnp.float32),
        "w1":       nrm(keys[5], (LAYERS, HIDDEN, FFN), dtype=jnp.bfloat16),
        "b1":       jnp.zeros((LAYERS, 1, FFN), jnp.float32),
        "w2":       nrm(keys[6], (LAYERS, FFN, HIDDEN), dtype=jnp.bfloat16),
        "b2":       jnp.zeros((LAYERS, 1, HIDDEN), jnp.float32),
        "ln2_g":    jnp.ones((LAYERS, 1, HIDDEN), jnp.float32),
        "ln2_b":    jnp.zeros((LAYERS, 1, HIDDEN), jnp.float32),
    }


# ------------------------- full forward (NLIModel.forward) --------------------
def nli_forward(params, input_ids, attention_mask):
    B, S = input_ids.shape

    # Embeddings: plain-JAX glue.
    # TODO(synk): the gather + embedding LN could move in-kernel via scalar-
    # prefetched token ids (pl.Element row gather); left outside at this size.
    x = params["word_emb"][input_ids] + params["pos_emb"][None, :, :]       # (B,S,H)
    x = _layernorm(x, params["emb_ln_g"], params["emb_ln_b"])
    x = x.astype(jnp.bfloat16)                                              # (B,S,H)

    # Key-padding mask, (B, 1, S); the additive -1e9 bias is built in-kernel.
    key_mask = attention_mask.astype(jnp.float32).reshape(B, 1, S)

    # One fused Pallas kernel: all encoder layers + classifier head.
    logits = run_fused_encoder(x, key_mask, params)                         # (B, 3)
    return logits


if __name__ == "__main__":
    key = jax.random.PRNGKey(0)
    pkey, ikey = jax.random.split(key)

    params = init_params(pkey)
    input_ids = jax.random.randint(ikey, (BATCH, SEQ), 0, VOCAB, dtype=jnp.int32)
    attention_mask = jnp.array([[1, 1, 1, 1, 1, 1, 1, 1],
                                [1, 1, 1, 1, 1, 1, 0, 0]], dtype=jnp.int32)

    logits = jax.jit(nli_forward)(params, input_ids, attention_mask)
    jax.block_until_ready(logits)
    assert logits.shape == (BATCH, NUM_LABELS) and logits.dtype == jnp.float32
    print("KERNEL_OK")
</pallas_src>

<mosaic_0001>
module attributes {stable_mosaic.version = 11 : i64} {
  func.func @fused_encoder_kernel(%arg0: i32, %arg1: i32, %arg2: memref<1x8x128xbf16, #tpu.memory_space<vmem>>, %arg3: memref<1x1x8xf32, #tpu.memory_space<vmem>>, %arg4: memref<1x128x384xbf16, #tpu.memory_space<vmem>>, %arg5: memref<1x1x384xf32, #tpu.memory_space<vmem>>, %arg6: memref<1x128x128xbf16, #tpu.memory_space<vmem>>, %arg7: memref<1x1x128xf32, #tpu.memory_space<vmem>>, %arg8: memref<1x1x128xf32, #tpu.memory_space<vmem>>, %arg9: memref<1x1x128xf32, #tpu.memory_space<vmem>>, %arg10: memref<1x128x256xbf16, #tpu.memory_space<vmem>>, %arg11: memref<1x1x256xf32, #tpu.memory_space<vmem>>, %arg12: memref<1x256x128xbf16, #tpu.memory_space<vmem>>, %arg13: memref<1x1x128xf32, #tpu.memory_space<vmem>>, %arg14: memref<1x1x128xf32, #tpu.memory_space<vmem>>, %arg15: memref<1x1x128xf32, #tpu.memory_space<vmem>>, %arg16: memref<128x3xbf16, #tpu.memory_space<vmem>>, %arg17: memref<1x3xf32, #tpu.memory_space<vmem>>, %arg18: memref<1x1x3xf32, #tpu.memory_space<vmem>>, %arg19: memref<8x128xbf16, #tpu.memory_space<vmem>>) attributes {dimension_semantics = [#tpu.dimension_semantics<parallel>, #tpu.dimension_semantics<arbitrary>], iteration_bounds = array<i64: 2, 2>, scalar_prefetch = 0 : i64, scratch_operands = 1 : i64, tpu.core_type = #tpu.core_type<tc>, window_params = [{transform_indices = @transform_0, window_bounds = array<i64: 1, 8, 128>}, {transform_indices = @transform_1, window_bounds = array<i64: 1, 1, 8>}, {transform_indices = @transform_2, window_bounds = array<i64: 1, 128, 384>}, {transform_indices = @transform_3, window_bounds = array<i64: 1, 1, 384>}, {transform_indices = @transform_4, window_bounds = array<i64: 1, 128, 128>}, {transform_indices = @transform_5, window_bounds = array<i64: 1, 1, 128>}, {transform_indices = @transform_6, window_bounds = array<i64: 1, 1, 128>}, {transform_indices = @transform_7, window_bounds = array<i64: 1, 1, 128>}, {transform_indices = @transform_8, window_bounds = array<i64: 1, 128, 256>}, {transform_indices = @transform_9, window_bounds = array<i64: 1, 1, 256>}, {transform_indices = @transform_10, window_bounds = array<i64: 1, 256, 128>}, {transform_indices = @transform_11, window_bounds = array<i64: 1, 1, 128>}, {transform_indices = @transform_12, window_bounds = array<i64: 1, 1, 128>}, {transform_indices = @transform_13, window_bounds = array<i64: 1, 1, 128>}, {pipeline_mode = #tpu.pipeline_mode<synchronous>, transform_indices = @transform_14, window_bounds = array<i64: 128, 3>}, {pipeline_mode = #tpu.pipeline_mode<synchronous>, transform_indices = @transform_15, window_bounds = array<i64: 1, 3>}, {transform_indices = @transform_16, window_bounds = array<i64: 1, 1, 3>}]} {
    %c0_i32 = arith.constant 0 : i32
    %0 = arith.cmpi eq, %arg1, %c0_i32 : i32
    %1 = arith.extui %0 : i1 to i32
    %c0_i32_0 = arith.constant 0 : i32
    %2 = arith.cmpi ne, %1, %c0_i32_0 : i32
    scf.if %2 {
      %c0_71 = arith.constant 0 : index
      %c0_72 = arith.constant 0 : index
      %c0_73 = arith.constant 0 : index
      %152 = vector.load %arg2[%c0_71, %c0_72, %c0_73] : memref<1x8x128xbf16, #tpu.memory_space<vmem>>, vector<1x8x128xbf16>
      %153 = vector.shape_cast %152 : vector<1x8x128xbf16> to vector<8x128xbf16>
      %c0_74 = arith.constant 0 : index
      %c0_75 = arith.constant 0 : index
      %154 = vector.load %arg19[%c0_74, %c0_75] : memref<8x128xbf16, #tpu.memory_space<vmem>>, vector<8x128xbf16>
      tpu.vector_store %arg19[%c0_74, %c0_75], %153 {strides = array<i32>} : memref<8x128xbf16, #tpu.memory_space<vmem>>, vector<8x128xbf16>,
    } else {
    }
    %c0 = arith.constant 0 : index
    %c0_1 = arith.constant 0 : index
    %3 = vector.load %arg19[%c0, %c0_1] : memref<8x128xbf16, #tpu.memory_space<vmem>>, vector<8x128xbf16>
    %c0_2 = arith.constant 0 : index
    %c0_3 = arith.constant 0 : index
    %c0_4 = arith.constant 0 : index
    %4 = vector.load %arg3[%c0_2, %c0_3, %c0_4] : memref<1x1x8xf32, #tpu.memory_space<vmem>>, vector<1x1x8xf32>
    %5 = vector.shape_cast %4 : vector<1x1x8xf32> to vector<1x8xf32>
    %cst = arith.constant 1.000000e+00 : f32
    %6 = vector.broadcast %cst : f32 to vector<1x8xf32>
    %7 = arith.subf %6, %5 : vector<1x8xf32>
    %cst_5 = arith.constant -1.000000e+09 : f32
    %8 = vector.broadcast %cst_5 : f32 to vector<1x8xf32>
    %9 = arith.mulf %7, %8 : vector<1x8xf32>
    %c0_6 = arith.constant 0 : index
    %c0_7 = arith.constant 0 : index
    %c0_8 = arith.constant 0 : index
    %10 = vector.load %arg4[%c0_6, %c0_7, %c0_8] : memref<1x128x384xbf16, #tpu.memory_space<vmem>>, vector<1x128x384xbf16>
    %11 = vector.shape_cast %10 : vector<1x128x384xbf16> to vector<128x384xbf16>
    %cst_9 = arith.constant dense<0.000000e+00> : vector<8x384xf32>
    %12 = tpu.matmul %3, %11, %cst_9 {dimension_numbers = #tpu.dot_dimension_numbers<[1], [0], [0], [1], [0, 0, 1, 1], [], []>} : vector<8x128xbf16>, vector<128x384xbf16>, vector<8x384xf32> -> vector<8x384xf32>
    %c0_10 = arith.constant 0 : index
    %c0_11 = arith.constant 0 : index
    %c0_12 = arith.constant 0 : index
    %13 = vector.load %arg5[%c0_10, %c0_11, %c0_12] : memref<1x1x384xf32, #tpu.memory_space<vmem>>, vector<1x1x384xf32>
    %14 = vector.shape_cast %13 : vector<1x1x384xf32> to vector<1x384xf32>
    %15 = vector.broadcast %14 : vector<1x384xf32> to vector<8x384xf32>
    %16 = arith.addf %12, %15 : vector<8x384xf32>
    %17 = arith.truncf %16 : vector<8x384xf32> to vector<8x384xbf16>
    %18 = vector.extract_strided_slice %17 {offsets = [0, 0], sizes = [8, 64], strides = [1, 1]} : vector<8x384xbf16> to vector<8x64xbf16>
    %19 = vector.extract_strided_slice %17 {offsets = [0, 128], sizes = [8, 64], strides = [1, 1]} : vector<8x384xbf16> to vector<8x64xbf16>
    %20 = vector.extract_strided_slice %17 {offsets = [0, 256], sizes = [8, 64], strides = [1, 1]} : vector<8x384xbf16> to vector<8x64xbf16>
    %cst_13 = arith.constant dense<0.000000e+00> : vector<8x8xf32>
    %21 = tpu.matmul %18, %19, %cst_13 {dimension_numbers = #tpu.dot_dimension_numbers<[1], [1], [0], [0], [0, 0, 1, 0], [], []>} : vector<8x64xbf16>, vector<8x64xbf16>, vector<8x8xf32> -> vector<8x8xf32>
    %22 = vector.broadcast %9 : vector<1x8xf32> to vector<8x8xf32>
    %23 = arith.addf %21, %22 : vector<8x8xf32>
    %cst_14 = arith.constant dense<0xFF800000> : vector<8xf32>
    %24 = vector.multi_reduction <maximumf>, %23, %cst_14 [1] : vector<8x8xf32> to vector<8xf32>
    %25 = vector.shape_cast %24 : vector<8xf32> to vector<8x1xf32>
    %26 = vector.broadcast %25 : vector<8x1xf32> to vector<8x8xf32>
    %27 = arith.subf %23, %26 : vector<8x8xf32>
    %28 = math.exp %27 : vector<8x8xf32>
    %cst_15 = arith.constant dense<0.000000e+00> : vector<8xf32>
    %29 = vector.multi_reduction <add>, %28, %cst_15 [1] : vector<8x8xf32> to vector<8xf32>
    %30 = vector.shape_cast %29 : vector<8xf32> to vector<8x1xf32>
    %31 = tpu.reciprocal %30 {approx = true} : vector<8x1xf32> -> vector<8x1xf32>
    %32 = vector.broadcast %31 : vector<8x1xf32> to vector<8x8xf32>
    %33 = arith.mulf %28, %32 : vector<8x8xf32>
    %34 = arith.truncf %33 : vector<8x8xf32> to vector<8x8xbf16>
    %cst_16 = arith.constant dense<0.000000e+00> : vector<8x64xf32>
    %35 = tpu.matmul %34, %20, %cst_16 {dimension_numbers = #tpu.dot_dimension_numbers<[1], [0], [0], [1], [0, 0, 1, 1], [], []>} : vector<8x8xbf16>, vector<8x64xbf16>, vector<8x64xf32> -> vector<8x64xf32>
    %36 = vector.extract_strided_slice %17 {offsets = [0, 64], sizes = [8, 64], strides = [1, 1]} : vector<8x384xbf16> to vector<8x64xbf16>
    %37 = vector.extract_strided_slice %17 {offsets = [0, 192], sizes = [8, 64], strides = [1, 1]} : vector<8x384xbf16> to vector<8x64xbf16>
    %38 = vector.extract_strided_slice %17 {offsets = [0, 320], sizes = [8, 64], strides = [1, 1]} : vector<8x384xbf16> to vector<8x64xbf16>
    %cst_17 = arith.constant dense<0.000000e+00> : vector<8x8xf32>
    %39 = tpu.matmul %36, %37, %cst_17 {dimension_numbers = #tpu.dot_dimension_numbers<[1], [1], [0], [0], [0, 0, 1, 0], [], []>} : vector<8x64xbf16>, vector<8x64xbf16>, vector<8x8xf32> -> vector<8x8xf32>
    %40 = vector.broadcast %9 : vector<1x8xf32> to vector<8x8xf32>
    %41 = arith.addf %39, %40 : vector<8x8xf32>
    %cst_18 = arith.constant dense<0xFF800000> : vector<8xf32>
    %42 = vector.multi_reduction <maximumf>, %41, %cst_18 [1] : vector<8x8xf32> to vector<8xf32>
    %43 = vector.shape_cast %42 : vector<8xf32> to vector<8x1xf32>
    %44 = vector.broadcast %43 : vector<8x1xf32> to vector<8x8xf32>
    %45 = arith.subf %41, %44 : vector<8x8xf32>
    %46 = math.exp %45 : vector<8x8xf32>
    %cst_19 = arith.constant dense<0.000000e+00> : vector<8xf32>
    %47 = vector.multi_reduction <add>, %46, %cst_19 [1] : vector<8x8xf32> to vector<8xf32>
    %48 = vector.shape_cast %47 : vector<8xf32> to vector<8x1xf32>
    %49 = tpu.reciprocal %48 {approx = true} : vector<8x1xf32> -> vector<8x1xf32>
    %50 = vector.broadcast %49 : vector<8x1xf32> to vector<8x8xf32>
    %51 = arith.mulf %46, %50 : vector<8x8xf32>
    %52 = arith.truncf %51 : vector<8x8xf32> to vector<8x8xbf16>
    %cst_20 = arith.constant dense<0.000000e+00> : vector<8x64xf32>
    %53 = tpu.matmul %52, %38, %cst_20 {dimension_numbers = #tpu.dot_dimension_numbers<[1], [0], [0], [1], [0, 0, 1, 1], [], []>} : vector<8x8xbf16>, vector<8x64xbf16>, vector<8x64xf32> -> vector<8x64xf32>
    %54 = tpu.concatenate %35, %53 in 1 : vector<8x64xf32>, vector<8x64xf32> -> vector<8x128xf32>
    %55 = arith.truncf %54 : vector<8x128xf32> to vector<8x128xbf16>
    %c0_21 = arith.constant 0 : index
    %c0_22 = arith.constant 0 : index
    %c0_23 = arith.constant 0 : index
    %56 = vector.load %arg6[%c0_21, %c0_22, %c0_23] : memref<1x128x128xbf16, #tpu.memory_space<vmem>>, vector<1x128x128xbf16>
    %57 = vector.shape_cast %56 : vector<1x128x128xbf16> to vector<128x128xbf16>
    %cst_24 = arith.constant dense<0.000000e+00> : vector<8x128xf32>
    %58 = tpu.matmul %55, %57, %cst_24 {dimension_numbers = #tpu.dot_dimension_numbers<[1], [0], [0], [1], [0, 0, 1, 1], [], []>} : vector<8x128xbf16>, vector<128x128xbf16>, vector<8x128xf32> -> vector<8x128xf32>
    %c0_25 = arith.constant 0 : index
    %c0_26 = arith.constant 0 : index
    %c0_27 = arith.constant 0 : index
    %59 = vector.load %arg7[%c0_25, %c0_26, %c0_27] : memref<1x1x128xf32, #tpu.memory_space<vmem>>, vector<1x1x128xf32>
    %60 = vector.shape_cast %59 : vector<1x1x128xf32> to vector<1x128xf32>
    %61 = vector.broadcast %60 : vector<1x128xf32> to vector<8x128xf32>
    %62 = arith.addf %58, %61 : vector<8x128xf32>
    %63 = arith.extf %3 : vector<8x128xbf16> to vector<8x128xf32>
    %64 = arith.addf %63, %62 : vector<8x128xf32>
    %c0_28 = arith.constant 0 : index
    %c0_29 = arith.constant 0 : index
    %c0_30 = arith.constant 0 : index
    %65 = vector.load %arg8[%c0_28, %c0_29, %c0_30] : memref<1x1x128xf32, #tpu.memory_space<vmem>>, vector<1x1x128xf32>
    %66 = vector.shape_cast %65 : vector<1x1x128xf32> to vector<1x128xf32>
    %c0_31 = arith.constant 0 : index
    %c0_32 = arith.constant 0 : index
    %c0_33 = arith.constant 0 : index
    %67 = vector.load %arg9[%c0_31, %c0_32, %c0_33] : memref<1x1x128xf32, #tpu.memory_space<vmem>>, vector<1x1x128xf32>
    %68 = vector.shape_cast %67 : vector<1x1x128xf32> to vector<1x128xf32>
    %cst_34 = arith.constant dense<0.000000e+00> : vector<8xf32>
    %69 = vector.multi_reduction <add>, %64, %cst_34 [1] : vector<8x128xf32> to vector<8xf32>
    %70 = vector.shape_cast %69 : vector<8xf32> to vector<8x1xf32>
    %cst_35 = arith.constant 1.280000e+02 : f32
    %71 = vector.broadcast %cst_35 : f32 to vector<8x1xf32>
    %72 = arith.divf %70, %71 : vector<8x1xf32>
    %73 = vector.broadcast %72 : vector<8x1xf32> to vector<8x128xf32>
    %74 = arith.subf %64, %73 : vector<8x128xf32>
    %75 = arith.mulf %74, %74 : vector<8x128xf32>
    %cst_36 = arith.constant dense<0.000000e+00> : vector<8xf32>
    %76 = vector.multi_reduction <add>, %75, %cst_36 [1] : vector<8x128xf32> to vector<8xf32>
    %77 = vector.shape_cast %76 : vector<8xf32> to vector<8x1xf32>
    %cst_37 = arith.constant 1.280000e+02 : f32
    %78 = vector.broadcast %cst_37 : f32 to vector<8x1xf32>
    %79 = arith.divf %77, %78 : vector<8x1xf32>
    %80 = vector.broadcast %72 : vector<8x1xf32> to vector<8x128xf32>
    %81 = arith.subf %64, %80 : vector<8x128xf32>
    %cst_38 = arith.constant 9.99999974E-6 : f32
    %82 = vector.broadcast %cst_38 : f32 to vector<8x1xf32>
    %83 = arith.addf %79, %82 : vector<8x1xf32>
    %84 = math.rsqrt %83 : vector<8x1xf32>
    %85 = vector.broadcast %84 : vector<8x1xf32> to vector<8x128xf32>
    %86 = arith.mulf %81, %85 : vector<8x128xf32>
    %87 = vector.broadcast %66 : vector<1x128xf32> to vector<8x128xf32>
    %88 = arith.mulf %86, %87 : vector<8x128xf32>
    %89 = vector.broadcast %68 : vector<1x128xf32> to vector<8x128xf32>
    %90 = arith.addf %88, %89 : vector<8x128xf32>
    %91 = arith.truncf %90 : vector<8x128xf32> to vector<8x128xbf16>
    %c0_39 = arith.constant 0 : index
    %c0_40 = arith.constant 0 : index
    %c0_41 = arith.constant 0 : index
    %92 = vector.load %arg10[%c0_39, %c0_40, %c0_41] : memref<1x128x256xbf16, #tpu.memory_space<vmem>>, vector<1x128x256xbf16>
    %93 = vector.shape_cast %92 : vector<1x128x256xbf16> to vector<128x256xbf16>
    %cst_42 = arith.constant dense<0.000000e+00> : vector<8x256xf32>
    %94 = tpu.matmul %91, %93, %cst_42 {dimension_numbers = #tpu.dot_dimension_numbers<[1], [0], [0], [1], [0, 0, 1, 1], [], []>} : vector<8x128xbf16>, vector<128x256xbf16>, vector<8x256xf32> -> vector<8x256xf32>
    %c0_43 = arith.constant 0 : index
    %c0_44 = arith.constant 0 : index
    %c0_45 = arith.constant 0 : index
    %95 = vector.load %arg11[%c0_43, %c0_44, %c0_45] : memref<1x1x256xf32, #tpu.memory_space<vmem>>, vector<1x1x256xf32>
    %96 = vector.shape_cast %95 : vector<1x1x256xf32> to vector<1x256xf32>
    %97 = vector.broadcast %96 : vector<1x256xf32> to vector<8x256xf32>
    %98 = arith.addf %94, %97 : vector<8x256xf32>
    %99 = arith.mulf %98, %98 : vector<8x256xf32>
    %100 = arith.mulf %98, %99 : vector<8x256xf32>
    %cst_46 = arith.constant 4.471500e-02 : f32
    %101 = vector.broadcast %cst_46 : f32 to vector<8x256xf32>
    %102 = arith.mulf %101, %100 : vector<8x256xf32>
    %103 = arith.addf %98, %102 : vector<8x256xf32>
    %cst_47 = arith.constant 0.797884583 : f32
    %104 = vector.broadcast %cst_47 : f32 to vector<8x256xf32>
    %105 = arith.mulf %104, %103 : vector<8x256xf32>
    %106 = math.tanh %105 : vector<8x256xf32>
    %cst_48 = arith.constant 1.000000e+00 : f32
    %107 = vector.broadcast %cst_48 : f32 to vector<8x256xf32>
    %108 = arith.addf %107, %106 : vector<8x256xf32>
    %cst_49 = arith.constant 5.000000e-01 : f32
    %109 = vector.broadcast %cst_49 : f32 to vector<8x256xf32>
    %110 = arith.mulf %109, %108 : vector<8x256xf32>
    %111 = arith.mulf %98, %110 : vector<8x256xf32>
    %112 = arith.truncf %111 : vector<8x256xf32> to vector<8x256xbf16>
    %c0_50 = arith.constant 0 : index
    %c0_51 = arith.constant 0 : index
    %c0_52 = arith.constant 0 : index
    %113 = vector.load %arg12[%c0_50, %c0_51, %c0_52] : memref<1x256x128xbf16, #tpu.memory_space<vmem>>, vector<1x256x128xbf16>
    %114 = vector.shape_cast %113 : vector<1x256x128xbf16> to vector<256x128xbf16>
    %cst_53 = arith.constant dense<0.000000e+00> : vector<8x128xf32>
    %115 = tpu.matmul %112, %114, %cst_53 {dimension_numbers = #tpu.dot_dimension_numbers<[1], [0], [0], [1], [0, 0, 1, 1], [], []>} : vector<8x256xbf16>, vector<256x128xbf16>, vector<8x128xf32> -> vector<8x128xf32>
    %c0_54 = arith.constant 0 : index
    %c0_55 = arith.constant 0 : index
    %c0_56 = arith.constant 0 : index
    %116 = vector.load %arg13[%c0_54, %c0_55, %c0_56] : memref<1x1x128xf32, #tpu.memory_space<vmem>>, vector<1x1x128xf32>
    %117 = vector.shape_cast %116 : vector<1x1x128xf32> to vector<1x128xf32>
    %118 = vector.broadcast %117 : vector<1x128xf32> to vector<8x128xf32>
    %119 = arith.addf %115, %118 : vector<8x128xf32>
    %120 = arith.addf %90, %119 : vector<8x128xf32>
    %c0_57 = arith.constant 0 : index
    %c0_58 = arith.constant 0 : index
    %c0_59 = arith.constant 0 : index
    %121 = vector.load %arg14[%c0_57, %c0_58, %c0_59] : memref<1x1x128xf32, #tpu.memory_space<vmem>>, vector<1x1x128xf32>
    %122 = vector.shape_cast %121 : vector<1x1x128xf32> to vector<1x128xf32>
    %c0_60 = arith.constant 0 : index
    %c0_61 = arith.constant 0 : index
    %c0_62 = arith.constant 0 : index
    %123 = vector.load %arg15[%c0_60, %c0_61, %c0_62] : memref<1x1x128xf32, #tpu.memory_space<vmem>>, vector<1x1x128xf32>
    %124 = vector.shape_cast %123 : vector<1x1x128xf32> to vector<1x128xf32>
    %cst_63 = arith.constant dense<0.000000e+00> : vector<8xf32>
    %125 = vector.multi_reduction <add>, %120, %cst_63 [1] : vector<8x128xf32> to vector<8xf32>
    %126 = vector.shape_cast %125 : vector<8xf32> to vector<8x1xf32>
    %cst_64 = arith.constant 1.280000e+02 : f32
    %127 = vector.broadcast %cst_64 : f32 to vector<8x1xf32>
    %128 = arith.divf %126, %127 : vector<8x1xf32>
    %129 = vector.broadcast %128 : vector<8x1xf32> to vector<8x128xf32>
    %130 = arith.subf %120, %129 : vector<8x128xf32>
    %131 = arith.mulf %130, %130 : vector<8x128xf32>
    %cst_65 = arith.constant dense<0.000000e+00> : vector<8xf32>
    %132 = vector.multi_reduction <add>, %131, %cst_65 [1] : vector<8x128xf32> to vector<8xf32>
    %133 = vector.shape_cast %132 : vector<8xf32> to vector<8x1xf32>
    %cst_66 = arith.constant 1.280000e+02 : f32
    %134 = vector.broadcast %cst_66 : f32 to vector<8x1xf32>
    %135 = arith.divf %133, %134 : vector<8x1xf32>
    %136 = vector.broadcast %128 : vector<8x1xf32> to vector<8x128xf32>
    %137 = arith.subf %120, %136 : vector<8x128xf32>
    %cst_67 = arith.constant 9.99999974E-6 : f32
    %138 = vector.broadcast %cst_67 : f32 to vector<8x1xf32>
    %139 = arith.addf %135, %138 : vector<8x1xf32>
    %140 = math.rsqrt %139 : vector<8x1xf32>
    %141 = vector.broadcast %140 : vector<8x1xf32> to vector<8x128xf32>
    %142 = arith.mulf %137, %141 : vector<8x128xf32>
    %143 = vector.broadcast %122 : vector<1x128xf32> to vector<8x128xf32>
    %144 = arith.mulf %142, %143 : vector<8x128xf32>
    %145 = vector.broadcast %124 : vector<1x128xf32> to vector<8x128xf32>
    %146 = arith.addf %144, %145 : vector<8x128xf32>
    %147 = arith.truncf %146 : vector<8x128xf32> to vector<8x128xbf16>
    %c0_68 = arith.constant 0 : index
    %c0_69 = arith.constant 0 : index
    %148 = vector.load %arg19[%c0_68, %c0_69] : memref<8x128xbf16, #tpu.memory_space<vmem>>, vector<8x128xbf16>
    tpu.vector_store %arg19[%c0_68, %c0_69], %147 {strides = array<i32>} : memref<8x128xbf16, #tpu.memory_space<vmem>>, vector<8x128xbf16>,
    %c1_i32 = arith.constant 1 : i32
    %149 = arith.cmpi eq, %arg1, %c1_i32 : i32
    %150 = arith.extui %149 : i1 to i32
    %c0_i32_70 = arith.constant 0 : i32
    %151 = arith.cmpi ne, %150, %c0_i32_70 : i32
    scf.if %151 {
      %152 = vector.extract_strided_slice %146 {offsets = [0, 0], sizes = [1, 128], strides = [1, 1]} : vector<8x128xf32> to vector<1x128xf32>
      %153 = arith.truncf %152 : vector<1x128xf32> to vector<1x128xbf16>
      %c0_71 = arith.constant 0 : index
      %c0_72 = arith.constant 0 : index
      %154 = vector.load %arg16[%c0_71, %c0_72] : memref<128x3xbf16, #tpu.memory_space<vmem>>, vector<128x3xbf16>
      %cst_73 = arith.constant dense<0.000000e+00> : vector<1x3xf32>
      %155 = tpu.matmul %153, %154, %cst_73 {dimension_numbers = #tpu.dot_dimension_numbers<[1], [0], [0], [1], [0, 0, 1, 1], [], []>} : vector<1x128xbf16>, vector<128x3xbf16>, vector<1x3xf32> -> vector<1x3xf32>
      %c0_74 = arith.constant 0 : index
      %c0_75 = arith.constant 0 : index
      %156 = vector.load %arg17[%c0_74, %c0_75] : memref<1x3xf32, #tpu.memory_space<vmem>>, vector<1x3xf32>
      %157 = arith.addf %155, %156 : vector<1x3xf32>
      %c0_76 = arith.constant 0 : index
      %c0_77 = arith.constant 0 : index
      %c0_78 = arith.constant 0 : index
      %158 = vector.load %arg18[%c0_76, %c0_77, %c0_78] : memref<1x1x3xf32, #tpu.memory_space<vmem>>, vector<1x1x3xf32>
      %159 = vector.shape_cast %158 : vector<1x1x3xf32> to vector<1x3xf32>
      %160 = vector.shape_cast %157 : vector<1x3xf32> to vector<1x1x3xf32>
      tpu.vector_store %arg18[%c0_76, %c0_77, %c0_78], %160 {strides = array<i32>} : memref<1x1x3xf32, #tpu.memory_space<vmem>>, vector<1x1x3xf32>,
    } else {
    }
    return
  }
  func.func @transform_0(%arg0: i32, %arg1: i32) -> (i32, i32, i32) {
    %c0_i32 = arith.constant 0 : i32
    %c0_i32_0 = arith.constant 0 : i32
    %c0_i32_1 = arith.constant 0 : i32
    return %arg0, %c0_i32, %c0_i32_0 : i32, i32, i32
  }
  func.func @transform_1(%arg0: i32, %arg1: i32) -> (i32, i32, i32) {
    %c0_i32 = arith.constant 0 : i32
    %c0_i32_0 = arith.constant 0 : i32
    %c0_i32_1 = arith.constant 0 : i32
    return %arg0, %c0_i32, %c0_i32_0 : i32, i32, i32
  }
  func.func @transform_2(%arg0: i32, %arg1: i32) -> (i32, i32, i32) {
    %c0_i32 = arith.constant 0 : i32
    %c0_i32_0 = arith.constant 0 : i32
    %c0_i32_1 = arith.constant 0 : i32
    return %arg1, %c0_i32, %c0_i32_0 : i32, i32, i32
  }
  func.func @transform_3(%arg0: i32, %arg1: i32) -> (i32, i32, i32) {
    %c0_i32 = arith.constant 0 : i32
    %c0_i32_0 = arith.constant 0 : i32
    %c0_i32_1 = arith.constant 0 : i32
    return %arg1, %c0_i32, %c0_i32_0 : i32, i32, i32
  }
  func.func @transform_4(%arg0: i32, %arg1: i32) -> (i32, i32, i32) {
    %c0_i32 = arith.constant 0 : i32
    %c0_i32_0 = arith.constant 0 : i32
    %c0_i32_1 = arith.constant 0 : i32
    return %arg1, %c0_i32, %c0_i32_0 : i32, i32, i32
  }
  func.func @transform_5(%arg0: i32, %arg1: i32) -> (i32, i32, i32) {
    %c0_i32 = arith.constant 0 : i32
    %c0_i32_0 = arith.constant 0 : i32
    %c0_i32_1 = arith.constant 0 : i32
    return %arg1, %c0_i32, %c0_i32_0 : i32, i32, i32
  }
  func.func @transform_6(%arg0: i32, %arg1: i32) -> (i32, i32, i32) {
    %c0_i32 = arith.constant 0 : i32
    %c0_i32_0 = arith.constant 0 : i32
    %c0_i32_1 = arith.constant 0 : i32
    return %arg1, %c0_i32, %c0_i32_0 : i32, i32, i32
  }
  func.func @transform_7(%arg0: i32, %arg1: i32) -> (i32, i32, i32) {
    %c0_i32 = arith.constant 0 : i32
    %c0_i32_0 = arith.constant 0 : i32
    %c0_i32_1 = arith.constant 0 : i32
    return %arg1, %c0_i32, %c0_i32_0 : i32, i32, i32
  }
  func.func @transform_8(%arg0: i32, %arg1: i32) -> (i32, i32, i32) {
    %c0_i32 = arith.constant 0 : i32
    %c0_i32_0 = arith.constant 0 : i32
    %c0_i32_1 = arith.constant 0 : i32
    return %arg1, %c0_i32, %c0_i32_0 : i32, i32, i32
  }
  func.func @transform_9(%arg0: i32, %arg1: i32) -> (i32, i32, i32) {
    %c0_i32 = arith.constant 0 : i32
    %c0_i32_0 = arith.constant 0 : i32
    %c0_i32_1 = arith.constant 0 : i32
    return %arg1, %c0_i32, %c0_i32_0 : i32, i32, i32
  }
  func.func @transform_10(%arg0: i32, %arg1: i32) -> (i32, i32, i32) {
    %c0_i32 = arith.constant 0 : i32
    %c0_i32_0 = arith.constant 0 : i32
    %c0_i32_1 = arith.constant 0 : i32
    return %arg1, %c0_i32, %c0_i32_0 : i32, i32, i32
  }
  func.func @transform_11(%arg0: i32, %arg1: i32) -> (i32, i32, i32) {
    %c0_i32 = arith.constant 0 : i32
    %c0_i32_0 = arith.constant 0 : i32
    %c0_i32_1 = arith.constant 0 : i32
    return %arg1, %c0_i32, %c0_i32_0 : i32, i32, i32
  }
  func.func @transform_12(%arg0: i32, %arg1: i32) -> (i32, i32, i32) {
    %c0_i32 = arith.constant 0 : i32
    %c0_i32_0 = arith.constant 0 : i32
    %c0_i32_1 = arith.constant 0 : i32
    return %arg1, %c0_i32, %c0_i32_0 : i32, i32, i32
  }
  func.func @transform_13(%arg0: i32, %arg1: i32) -> (i32, i32, i32) {
    %c0_i32 = arith.constant 0 : i32
    %c0_i32_0 = arith.constant 0 : i32
    %c0_i32_1 = arith.constant 0 : i32
    return %arg1, %c0_i32, %c0_i32_0 : i32, i32, i32
  }
  func.func @transform_14(%arg0: i32, %arg1: i32) -> (i32, i32) {
    %c0_i32 = arith.constant 0 : i32
    %c0_i32_0 = arith.constant 0 : i32
    %c0_i32_1 = arith.constant 0 : i32
    return %c0_i32, %c0_i32_0 : i32, i32
  }
  func.func @transform_15(%arg0: i32, %arg1: i32) -> (i32, i32) {
    %c0_i32 = arith.constant 0 : i32
    %c0_i32_0 = arith.constant 0 : i32
    %c0_i32_1 = arith.constant 0 : i32
    return %c0_i32, %c0_i32_0 : i32, i32
  }
  func.func @transform_16(%arg0: i32, %arg1: i32) -> (i32, i32, i32) {
    %c0_i32 = arith.constant 0 : i32
    %c0_i32_0 = arith.constant 0 : i32
    %c0_i32_1 = arith.constant 0 : i32
    return %arg0, %c0_i32, %c0_i32_0 : i32, i32, i32
  }
}

</mosaic_0001>

<bundles_post_ra>
// kernel: nli_forward.1
= control target key start
LH: loop header
LB: loop body
LE: loop exit
PB: predicated region body
PF: predicated region fallthrough
CT: control target
= control target key end

     0   :  { %s4740_s0 = inlined_call_operand.hbm [shape: bf16[2,8,128], index: 0, kind: input, shape index: {}]   ;;  %s4741_s1 = inlined_call_operand.hbm [shape: f32[2,1,8], index: 1, kind: input, shape index: {}]   ;;  %s4742_s2 = inlined_call_operand.hbm [shape: bf16[2,128,384], index: 2, kind: input, shape index: {}]   ;;  %s4743_s3 = inlined_call_operand.hbm [shape: f32[2,1,384], index: 3, kind: input, shape index: {}]   ;;  %s4744_s4 = inlined_call_operand.hbm [shape: bf16[2,128,128], index: 4, kind: input, shape index: {}]   ;;  %s4745_s5 = inlined_call_operand.hbm [shape: f32[2,1,128], index: 5, kind: input, shape index: {}]   ;;  %s4746_s6 = inlined_call_operand.hbm [shape: f32[2,1,128], index: 6, kind: input, shape index: {}]   ;;  %s4747_s7 = inlined_call_operand.hbm [shape: f32[2,1,128], index: 7, kind: input, shape index: {}]   ;;  %s4748_s8 = inlined_call_operand.hbm [shape: bf16[2,128,256], index: 8, kind: input, shape index: {}]   ;;  %s4749_s9 = inlined_call_operand.hbm [shape: f32[2,1,256], index: 9, kind: input, shape index: {}]   ;;  %s4750_s10 = inlined_call_operand.hbm [shape: bf16[2,256,128], index: 10, kind: input, shape index: {}]   ;;  %s4751_s11 = inlined_call_operand.hbm [shape: f32[2,1,128], index: 11, kind: input, shape index: {}]   ;;  %s4752_s12 = inlined_call_operand.hbm [shape: f32[2,1,128], index: 12, kind: input, shape index: {}]   ;;  %s4753_s13 = inlined_call_operand.hbm [shape: f32[2,1,128], index: 13, kind: input, shape index: {}]   ;;  %s4754_s14 = inlined_call_operand.hbm [shape: bf16[128,3], index: 14, kind: input, shape index: {}]   ;;  %s4755_s15 = inlined_call_operand.hbm [shape: f32[1,3], index: 15, kind: input, shape index: {}]   ;;  %s4756_s16 = inlined_call_operand.hbm [shape: f32[2,1,3], index: 16, kind: output, shape index: {}]  }
   0x1   :  { %4798 = sst [smem:[#allocation56_spill]] %s4740_s0 }
   0x2   :  { %4799 = sst [smem:[#allocation57_spill]] %s4741_s1 }
   0x3   :  { %4800 = sst [smem:[#allocation58_spill]] %s4742_s2 }
   0x4   :  { %4801 = sst [smem:[#allocation59_spill]] %s4743_s3 }
   0x5   :  { %4802 = sst [smem:[#allocation60_spill]] %s4744_s4 }
   0x6   :  { %4803 = sst [smem:[#allocation61_spill]] %s4745_s5 }
   0x7   :  { %4804 = sst [smem:[#allocation62_spill]] %s4746_s6 }
   0x8   :  { %4805 = sst [smem:[#allocation63_spill]] %s4747_s7 }
   0x9   :  { %4806 = sst [smem:[#allocation64_spill]] %s4748_s8 }
   0xa   :  { %4807 = sst [smem:[#allocation65_spill]] %s4749_s9 }
   0xb   :  { %4808 = sst [smem:[#allocation66_spill]] %s4750_s10 }
   0xc   :  { %4809 = sst [smem:[#allocation67_spill]] %s4752_s12 }
   0xd   :  { %4810 = sst [smem:[#allocation68_spill]] %s4753_s13 }
   0xe   :  { %4811 = sst [smem:[#allocation69_spill]] %s4754_s14 }
   0xf   :  { %4812 = sst [smem:[#allocation70_spill]] %s4755_s15 }
  0x10   :  { %4813 = sst [smem:[#allocation71_spill]] %s4756_s16 }
  0x11   :  { %21 = vsyncpa [#allocation4], 0 }
  0x12   :  { %23 = vsyncpa [#allocation4 + $0x1], 0 }
  0x13   :  { %24 = vsyncpa [#allocation7], 0 }
  0x14   :  { %26 = vsyncpa [#allocation7 + $0x1], 0 }
  0x15   :  { %27 = vsyncpa [#allocation10], 0 }
  0x16   :  { %29 = vsyncpa [#allocation10 + $0x1], 0 }
  0x17   :  { %30 = vsyncpa [#allocation13], 0 }
  0x18   :  { %32 = vsyncpa [#allocation13 + $0x1], 0 }
  0x19   :  { %33 = vsyncpa [#allocation16], 0 }
  0x1a   :  { %35 = vsyncpa [#allocation16 + $0x1], 0 }
  0x1b   :  { %36 = vsyncpa [#allocation19], 0 }
  0x1c   :  { %38 = vsyncpa [#allocation19 + $0x1], 0 }
  0x1d   :  { %39 = vsyncpa [#allocation22], 0 }
  0x1e   :  { %41 = vsyncpa [#allocation22 + $0x1], 0 }
  0x1f   :  { %42 = vsyncpa [#allocation25], 0 }
  0x20   :  { %44 = vsyncpa [#allocation25 + $0x1], 0 }
  0x21   :  { %45 = vsyncpa [#allocation28], 0 }
  0x22   :  { %46 = vsyncpa [#allocation5], 0 }
  0x23   :  { %48 = vsyncpa [#allocation5 + $0x1], 0  ;;  %s3796_s21 = smov 0   ;;  %s3798_s22 = smov 0  }
  0x24   :  { %s3800_s23 = smov 0   ;;  %s3802_s24 = smov 0  }
  0x25   :  { %s3804_s25 = smov 0   ;;  %s3806_s26 = smov 0  }
  0x26   :  { %s3808_s27 = smov 0   ;;  %s3810_s28 = smov 0  }
  0x27   :  { %s3812_s29 = smov 0   ;;  %s3814_s30 = smov 0  }
  0x28   :  { %s3816_s0 = smov 0  }
  0x29 LB: > { %4814 = sst [smem:[#allocation42_spill]] %s3642_s22  ;;  %s3852_s17 = sadd.s32 4294967295, %s3678_s0   ;;  %s3678_s0 = sphi %s3816_s0, %s54_s0   ;;  %s3674_s30 = sphi %s3814_s30, %s4906_s30   ;;  %s3670_s29 = sphi %s3812_s29, %s4905_s29   ;;  %s3666_s28 = sphi %s3810_s28, %s4904_s28   ;;  %s3662_s27 = sphi %s3808_s27, %s4903_s27   ;;  %s3658_s26 = sphi %s3806_s26, %s4902_s26   ;;  %s3654_s25 = sphi %s3804_s25, %s4901_s25   ;;  %s3650_s24 = sphi %s3802_s24, %s4895_s24   ;;  %s3646_s23 = sphi %s3800_s23, %s4900_s23   ;;  %s3642_s22 = sphi %s3798_s22, %s4899_s22   ;;  %s3638_s21 = sphi %s3796_s21, %s4893_s21  }
  0x2a   : > { %4815 = sst [smem:[#allocation43_spill]] %s3650_s24  ;;  %s2532_s18 = sadd.s32 4294967294, %s3678_s0  }
  0x2b   : > { %4816 = sst [smem:[#allocation44_spill]] %s3654_s25  ;;  %s63_s19 = sadd.s32 1, %s3670_s29 }
  0x2c   : > { %4817 = sst [smem:[#allocation45_spill]] %s3662_s27  ;;  %s66_s20 = sadd.s32 1, %s3674_s30 }
  0x2d   : > { %4818 = sst [smem:[#allocation46_spill]] %s3666_s28  ;;  %p64_p0 = scmp.ge.s32.totalorder %s63_s19, 2 }
  0x2e   : > { %4819 = sst [smem:[#allocation47_spill]] %s3852_s17  ;;  %s73_s16 = sadd.s32 1, %s3658_s26 }
  0x2f   : > { %p4767_p1 = scmp.ne.s32.totalorder %s3658_s26, %s3654_s25  ;;  %p81_p2 = scmp.eq.s32.totalorder %s3678_s0, 0 }
  0x30   : > { %s4908_s19 = smov (%p64_p0, %s63_s19), 0  ;;  %s4910_s20 = smov (!%p64_p0, %s66_s20), %s3674_s30 }
  0x31   : > { %4820 = sst [smem:[#allocation48_spill]] %s4908_s19  ;;  %p3869_p3 = por %p81_p2, %p4767_p1 }
  0x32   : > { %p4766_p4 = scmp.ne.s32.totalorder %s3654_s25, %s3650_s24  ;;  %p68_p5 = scmp.ge.s32.totalorder %s4910_s20, 2 }
  0x33   : > { %s4821_s28 = scalar_select %p3869_p3, 1, 0 }
  0x34   : > { %p4778_p6 = scmp.eq.s32.totalorder %s3852_s17, 0  ;;  %s122_s27 = ssub.s32 %s3670_s29, %s4908_s19 }
  0x35   : > { %s125_s13 = sadd.s32 1, %s3646_s23  ;;  %s4912_s20 = smov (%p68_p5, %s4910_s20), 0 }
  0x36   : > { %4822 = sst [smem:[#allocation49_spill]] %s4912_s20  ;;  %p3886_p7 = por %p4778_p6, %p4766_p4 }
  0x37   : > { %p123_p8 = scmp.eq.s32.totalorder %s122_s27, 0  ;;  %s70_s10 = ssub.s32 %s3674_s30, %s4912_s20 }
  0x38   : > { %s4823_s12 = scalar_select %p3886_p7, 1, 0 }
  0x39   : > { %p132_p9 = scmp.ne.s32.totalorder %s3646_s23, %s3642_s22  ;;  %p71_p10 = scmp.eq.s32.totalorder %s70_s10, 0 }
  0x3a   : > { %4824 = sst [smem:[#allocation50_spill]] %s4823_s12  ;;  %p138_p11 = scmp.ne.s32.totalorder %s3642_s22, %s3638_s21 }
  0x3b   : > { %s3897_s19 = scalar_select %p123_p8, %s3646_s23, %s125_s13  }
  0x3c   : > { %s3900_s8 = scalar_select %p71_p10, %s3658_s26, %s73_s16  }
  0x3d   : > { %4825 = sst [smem:[#allocation51_spill]] %s3897_s19  ;;  %p3904_p12 = por %p132_p9, %p81_p2 }
  0x3e   : > { %4826 = sst [smem:[#allocation52_spill]] %s3900_s8  ;;  %p3910_p13 = por %p138_p11, %p4778_p6 }
  0x3f   : > { %s4827_s6 = scalar_select %p3904_p12, 1, 0 }
  0x40   : > { %s4828_s4 = scalar_select %p3910_p13, 1, 0 }
  0x41   : > { %p490_p0 = scmp.eq.s32.totalorder %s3852_s17, 3  ;;  %p496_p5 = scmp.eq.s32.totalorder %s2532_s18, 3 }
  0x42   : > { %4829 = sst [smem:[#allocation53_spill]] %s4828_s4  ;;  %p2533_p4 = scmp.ge.s32.totalorder %s3678_s0, 1 }
  0x43   : > { %p503_p1 = scmp.lt.s32.totalorder %s3678_s0, 5  ;;  %p4830_p7 = scmp.ne.s32.totalorder %s3658_s26, %s3654_s25 }
  0x44   : > { %p4833_p8 = scmp.ne.s32.totalorder %s3654_s25, %s3650_s24  ;;  %s3680_s21 = smov [#allocation26]  }
  0x45   : > { %p3920_p3 = por %p490_p0, %p4830_p7  ;;  %p3931_p2 = pnand %p2533_p4, %p503_p1 }
  0x46   : > { %p3927_p10 = por %p496_p5, %p4833_p8  ;;  %s515_s27 = sshll.u32 %s3680_s21, 4  ;;  %s516_s27 = int_to_ptr.vmem [resolvable:$true] %s515_s27 }
  0x47   : > { %s4831_s10 = scalar_select %p3920_p3, 1, 0 }
  0x48   : > { %s4834_s13 = scalar_select %p3927_p10, 1, 0 }
  0x49   : > { %4832 = sst [smem:[#allocation54_spill]] %s4831_s10  ;;  %p2844_p9 = pneg %p3931_p2 }
  0x4a   : > { %4835 = sst [smem:[#allocation55_spill]] %s4834_s13  ;;  %s3681_s20 = smov [#allocation27]  }
  0x4b   : > { %s4836_s16 = scalar_select %p3931_p2, 1, 0 }
  0x4c   : > { %p3939_p7 = pnand %p2844_p9, %p4778_p6  ;;  %s529_s8 = sshll.u32 %s3681_s20, 4  ;;  %s3943_s8 = int_to_ptr.vmem [resolvable:$true] %s529_s8 }
  0x4d   : > { %s4838_s14 = sld [smem:[#allocation69_spill]] }
  0x4e   : > { %p3070_p4 = pneg %p3939_p7 }
  0x53   : > { %s3068_s24 = scalar_lea.hbm %s4838_s14, 1024 }
  0x54   : > { %p3069_p1 = scmp.ne.s32.totalorder %s4838_s14, %s3068_s24  ;;  %p3075_p5 = scmp.lt.u32.totalorder %s3068_s24, %s4838_s14 }
  0x56   : > { %p3071_p11 = pnand %p3070_p4, %p3069_p1 }
  0x58   : > { %p3072_p0 = pneg %p3071_p11 }
  0x5a   : > { %p3077_p8 = pnand %p3075_p5, %p3072_p0 }
  0x5c   : > { %3080 = shalt.err (!%p3077_p8)
}
  0x5d   : > { %s3081_s20 = scalar_lea.vmem %s516_s27, 1024  ;;  %p3089_p3 = scmp.lt.s32.totalorder %s516_s27, %s516_s27 }
  0x5e   : > { %p3082_p9 = scmp.ne.s32.totalorder %s516_s27, %s3081_s20  ;;  %p3090_p13 = scmp.lt.s32.totalorder %s3081_s20, %s3081_s20 }
  0x60   : > { %p3084_p6 = pnand %p3082_p9, %p3070_p4  ;;  %p3091_p2 = por %p3090_p13, %p3089_p3 }
  0x62   : > { %p3085_p10 = pneg %p3084_p6 }
  0x64   : > { %p3092_p12 = pnand %p3091_p2, %p3085_p10 }
  0x66   : > { %3095 = shalt.err (!%p3092_p12)
}
  0x67   : > { %s3682_s4 = smov 64   ;;  %s3683_s19 = smov 4  }
  0x68   : > { %2847 = dma.hbm_to_vmem [thread:$0]  (!%p3939_p7), %s4838_s14, 1024, %s516_s27, [#allocation25], %s3682_s4, %s3682_s4, %s3683_s19  }
  0x69   : > { %s4839_s15 = sld [smem:[#allocation70_spill]] }
  0x6f   : > { %s3096_s21 = scalar_lea.hbm %s4839_s15, 16 }
  0x70   : > { %p3097_p6 = scmp.ne.s32.totalorder %s4839_s15, %s3096_s21  ;;  %p3103_p13 = scmp.lt.u32.totalorder %s3096_s21, %s4839_s15 }
  0x72   : > { %p3099_p3 = pnand %p3097_p6, %p3070_p4 }
  0x74   : > { %p3100_p12 = pneg %p3099_p3 }
  0x76   : > { %p3105_p10 = pnand %p3103_p13, %p3100_p12 }
  0x78   : > { %3108 = shalt.err (!%p3105_p10)
}
  0x79   : > { %s3109_s27 = scalar_lea.vmem %s3943_s8, 16  ;;  %s3116_s12 = scalar_lea.vmem %s3943_s8, 32 }
  0x7a   : > { %p3110_p2 = scmp.ne.s32.totalorder %s3943_s8, %s3109_s27  ;;  %p3117_p0 = scmp.lt.s32.totalorder %s3943_s8, %s3943_s8 }
  0x7b   : > { %p3118_p5 = scmp.lt.s32.totalorder %s3116_s12, %s3109_s27 }
  0x7c   : > { %p3112_p1 = pnand %p3110_p2, %p3070_p4 }
  0x7d   : > { %p3119_p8 = por %p3118_p5, %p3117_p0 }
  0x7e   : > { %p3113_p11 = pneg %p3112_p1 }
  0x80   : > { %p3120_p9 = pnand %p3119_p8, %p3113_p11 }
  0x82   : > { %3123 = shalt.err (!%p3120_p9)
}
  0x83   : > { %2850 = dma.hbm_to_vmem [thread:$0]  (!%p3939_p7), %s4839_s15, 16, %s3943_s8, [#allocation28]  }
  0x84   : > { %p2536_p6 = scmp.ge.s32.totalorder %s3678_s0, 4 }
  0x85   : > { %s3995_s4 = sand.u32 (!%p2536_p6), 1, %s3658_s26   ;;  %s3998_s19 = sand.u32 (!%p2536_p6), 1, %s3678_s0  }
  0x86   : > { %536 = sbr.rel (%p2536_p6) target bundleno = 526 (0x20e), region = 24  ;;  %s2539_s22 = sshll.u32 (!%p2536_p6), %s3674_s30, 4 }
  0x87   : > { %s561_s18 = scalar_lea.vmem (!%p2536_p6), [#allocation6], %s3995_s4  ;;  %s4840_s1 = sld [smem:[#allocation57_spill]] (!%p2536_p6) }
  0x88   : > { %s568_s24 = sshll.u32 (!%p2536_p6), %s561_s18, 4  ;;  %s4788_s21 = scalar_lea.sflag (!%p2536_p6), [#allocation7], %s3998_s19  ;;  %s569_s24 = int_to_ptr.vmem [resolvable:$true] %s568_s24 }
  0x89   : > { %p4841_p4 = scmp.ne.s32.totalorder (!%p2536_p6), %s4821_s28, 0 }
  0x8d   : > { %s4005_s8 = scalar_lea.hbm %s4840_s1, %s2539_s22  ;;  %s3128_s25 = scalar_lea.hbm %s4840_s1, 32 }
  0x8e   : > { %s3124_s20 = scalar_lea.hbm %s4005_s8, 16  ;;  %p3129_p13 = scmp.lt.u32.totalorder %s4005_s8, %s4840_s1 }
  0x8f   : > { %p3125_p7 = scmp.ne.s32.totalorder %s4005_s8, %s3124_s20  ;;  %p3130_p10 = scmp.lt.u32.totalorder %s3128_s25, %s3124_s20 }
  0x90   : > { %p3132_p1 = scmp.lt.u32.totalorder %s3124_s20, %s4005_s8 }
  0x91   : > { %p3126_p3 = pnand %p3125_p7, %p4841_p4  ;;  %p3131_p2 = por %p3130_p10, %p3129_p13 }
  0x93   : > { %p3127_p12 = pneg %p3126_p3  ;;  %p3133_p11 = por %p3132_p1, %p3131_p2 }
  0x95   : > { %p3134_p0 = pnand %p3133_p11, %p3127_p12 }
  0x97   : > { %3137 = shalt.err (!%p3134_p0)
}
  0x98   : > { %s3138_s22 = scalar_lea.vmem %s569_s24, 16  ;;  %s3684_s10 = smov [#allocation6]  }
  0x99   : > { %p3139_p5 = scmp.ne.s32.totalorder %s569_s24, %s3138_s22  ;;  %s3142_s13 = sshll.u32 %s3684_s10, 4  ;;  %s3143_s13 = int_to_ptr.vmem [resolvable:$false] %s3142_s13 }
  0x9a   : > { %s3144_s27 = scalar_lea.vmem %s3143_s13, 32  ;;  %p3145_p6 = scmp.lt.s32.totalorder %s569_s24, %s3143_s13 }
  0x9b   : > { %p3140_p8 = pnand %p3139_p5, %p4841_p4  ;;  %p3146_p7 = scmp.lt.s32.totalorder %s3144_s27, %s3138_s22 }
  0x9d   : > { %p3141_p9 = pneg %p3140_p8  ;;  %p3147_p3 = por %p3146_p7, %p3145_p6 }
  0x9f   : > { %p3148_p10 = pnand %p3147_p3, %p3141_p9 }
  0xa1   : > { %3151 = shalt.err (!%p3148_p10)
}
  0xa2   : > { %2811 = dma.hbm_to_vmem [thread:$0]  (%p4841_p4), %s4005_s8, 16, %s569_s24, %s4788_s21  }
  0xa3   : > { %s4028_s20 = sand.u32 1, %s3646_s23   ;;  %s2803_s25 = smul.u32 48, %s3670_s29 }
  0xa4   : > { %s2802_s12 = smul.u32 3, %s4028_s20  ;;  %s4033_s17 = sshll.u32 %s3670_s29, 4 }
  0xa5   : > { %s4842_s3 = sld [smem:[#allocation59_spill]]  ;;  %s4843_s5 = sld [smem:[#allocation61_spill]] }
  0xa6   : > { %s600_s13 = scalar_lea.vmem [#allocation9], %s2802_s12  ;;  %s4793_s1 = scalar_lea.sflag [#allocation10], %s3998_s19 }
  0xa7   : > { %s608_s27 = sshll.u32 %s600_s13, 4  ;;  %p4844_p13 = scmp.ne.s32.totalorder %s4827_s6, 0  ;;  %s4040_s27 = int_to_ptr.vmem [resolvable:$true] %s608_s27 }
  0xab   : > { %s4038_s10 = scalar_lea.hbm %s4842_s3, %s2803_s25  ;;  %s4046_s21 = scalar_lea.hbm %s4843_s5, %s4033_s17 }
  0xac   : > { %s3152_s14 = scalar_lea.hbm %s4038_s10, 48  ;;  %s3156_s22 = scalar_lea.hbm %s4842_s3, 96 }
  0xad   : > { %p3153_p12 = scmp.ne.s32.totalorder %s4038_s10, %s3152_s14  ;;  %p3157_p11 = scmp.lt.u32.totalorder %s4038_s10, %s4842_s3 }
  0xae   : > { %p3158_p0 = scmp.lt.u32.totalorder %s3156_s22, %s3152_s14  ;;  %p3160_p8 = scmp.lt.u32.totalorder %s3152_s14, %s4038_s10 }
  0xaf   : > { %p3154_p2 = pnand %p3153_p12, %p4844_p13 }
  0xb0   : > { %p3159_p5 = por %p3158_p0, %p3157_p11 }
  0xb1   : > { %p3155_p1 = pneg %p3154_p2 }
  0xb2   : > { %p3161_p9 = por %p3160_p8, %p3159_p5 }
  0xb4   : > { %p3162_p6 = pnand %p3161_p9, %p3155_p1 }
  0xb6   : > { %3165 = shalt.err (!%p3162_p6)
}
  0xb7   : > { %s3166_s13 = scalar_lea.vmem %s4040_s27, 48  ;;  %s3685_s24 = smov [#allocation9]  }
  0xb8   : > { %p3167_p7 = scmp.ne.s32.totalorder %s4040_s27, %s3166_s13  ;;  %s3170_s8 = sshll.u32 %s3685_s24, 4  ;;  %s3171_s8 = int_to_ptr.vmem [resolvable:$false] %s3170_s8 }
  0xb9   : > { %s3172_s15 = scalar_lea.vmem %s3171_s8, 96  ;;  %p3173_p12 = scmp.lt.s32.totalorder %s4040_s27, %s3171_s8 }
  0xba   : > { %p3168_p3 = pnand %p3167_p7, %p4844_p13  ;;  %p3174_p2 = scmp.lt.s32.totalorder %s3172_s15, %s3166_s13 }
  0xbc   : > { %p3169_p10 = pneg %p3168_p3  ;;  %p3175_p11 = por %p3174_p2, %p3173_p12 }
  0xbe   : > { %p3176_p0 = pnand %p3175_p11, %p3169_p10 }
  0xc0   : > { %3179 = shalt.err (!%p3176_p0)
}
  0xc1   : > { %2813 = dma.hbm_to_vmem [thread:$0]  (%p4844_p13), %s4038_s10, 48, %s4040_s27, %s4793_s1  }
  0xc2   : > { %s639_s14 = scalar_lea.vmem [#allocation12], %s4028_s20  ;;  %s4790_s18 = scalar_lea.sflag [#allocation13], %s3998_s19 }
  0xc3   : > { %s646_s25 = sshll.u32 %s639_s14, 4  ;;  %s3180_s22 = scalar_lea.hbm %s4046_s21, 16  ;;  %s647_s25 = int_to_ptr.vmem [resolvable:$true] %s646_s25 }
  0xc4   : > { %p3181_p1 = scmp.ne.s32.totalorder %s4046_s21, %s3180_s22  ;;  %s3184_s24 = scalar_lea.hbm %s4843_s5, 32 }
  0xc5   : > { %p3185_p9 = scmp.lt.u32.totalorder %s4046_s21, %s4843_s5  ;;  %p3186_p6 = scmp.lt.u32.totalorder %s3184_s24, %s3180_s22 }
  0xc6   : > { %p3182_p5 = pnand %p3181_p1, %p4844_p13  ;;  %p3188_p3 = scmp.lt.u32.totalorder %s3180_s22, %s4046_s21 }
  0xc7   : > { %p3187_p7 = por %p3186_p6, %p3185_p9 }
  0xc8   : > { %p3183_p8 = pneg %p3182_p5 }
  0xc9   : > { %p3189_p10 = por %p3188_p3, %p3187_p7 }
  0xcb   : > { %p3190_p12 = pnand %p3189_p10, %p3183_p8 }
  0xcd   : > { %3193 = shalt.err (!%p3190_p12)
}
  0xce   : > { %s3194_s10 = scalar_lea.vmem %s647_s25, 16  ;;  %s3686_s27 = smov [#allocation12]  }
  0xcf   : > { %p3195_p2 = scmp.ne.s32.totalorder %s647_s25, %s3194_s10  ;;  %s3198_s14 = sshll.u32 %s3686_s27, 4  ;;  %s3199_s14 = int_to_ptr.vmem [resolvable:$false] %s3198_s14 }
  0xd0   : > { %s3200_s12 = scalar_lea.vmem %s3199_s14, 32  ;;  %p3201_p1 = scmp.lt.s32.totalorder %s647_s25, %s3199_s14 }
  0xd1   : > { %p3196_p11 = pnand %p3195_p2, %p4844_p13  ;;  %p3202_p5 = scmp.lt.s32.totalorder %s3200_s12, %s3194_s10 }
  0xd3   : > { %p3197_p0 = pneg %p3196_p11  ;;  %p3203_p4 = por %p3202_p5, %p3201_p1 }
  0xd5   : > { %p3204_p6 = pnand %p3203_p4, %p3197_p0 }
  0xd7   : > { %3207 = shalt.err (!%p3204_p6)
}
  0xd8   : > { %2815 = dma.hbm_to_vmem [thread:$0]  (%p4844_p13), %s4046_s21, 16, %s647_s25, %s4790_s18  }
  0xd9   : > { %s4845_s7 = sld [smem:[#allocation63_spill]]  ;;  %s673_s8 = scalar_lea.vmem [#allocation15], %s4028_s20 }
  0xda   : > { %s680_s15 = sshll.u32 %s673_s8, 4  ;;  %s4791_s10 = scalar_lea.sflag [#allocation16], %s3998_s19  ;;  %s681_s15 = int_to_ptr.vmem [resolvable:$true] %s680_s15 }
  0xdf   : > { %s4097_s24 = scalar_lea.hbm %s4845_s7, %s4033_s17  ;;  %s3212_s25 = scalar_lea.hbm %s4845_s7, 32 }
  0xe0   : > { %s3208_s27 = scalar_lea.hbm %s4097_s24, 16  ;;  %p3213_p7 = scmp.lt.u32.totalorder %s4097_s24, %s4845_s7 }
  0xe1   : > { %p3209_p4 = scmp.ne.s32.totalorder %s4097_s24, %s3208_s27  ;;  %p3214_p3 = scmp.lt.u32.totalorder %s3212_s25, %s3208_s27 }
  0xe2   : > { %p3216_p12 = scmp.lt.u32.totalorder %s3208_s27, %s4097_s24 }
  0xe3   : > { %p3210_p8 = pnand %p3209_p4, %p4844_p13  ;;  %p3215_p10 = por %p3214_p3, %p3213_p7 }
  0xe5   : > { %p3211_p9 = pneg %p3210_p8  ;;  %p3217_p2 = por %p3216_p12, %p3215_p10 }
  0xe7   : > { %p3218_p11 = pnand %p3217_p2, %p3211_p9 }
  0xe9   : > { %3221 = shalt.err (!%p3218_p11)
}
  0xea   : > { %s3222_s13 = scalar_lea.vmem %s681_s15, 16  ;;  %s3687_s8 = smov [#allocation15]  }
  0xeb   : > { %p3223_p0 = scmp.ne.s32.totalorder %s681_s15, %s3222_s13  ;;  %s3226_s18 = sshll.u32 %s3687_s8, 4  ;;  %s3227_s18 = int_to_ptr.vmem [resolvable:$false] %s3226_s18 }
  0xec   : > { %s3228_s14 = scalar_lea.vmem %s3227_s18, 32  ;;  %p3229_p6 = scmp.lt.s32.totalorder %s681_s15, %s3227_s18 }
  0xed   : > { %p3224_p1 = pnand %p3223_p0, %p4844_p13  ;;  %p3230_p4 = scmp.lt.s32.totalorder %s3228_s14, %s3222_s13 }
  0xef   : > { %p3225_p5 = pneg %p3224_p1  ;;  %p3231_p8 = por %p3230_p4, %p3229_p6 }
  0xf1   : > { %p3232_p3 = pnand %p3231_p8, %p3225_p5 }
  0xf3   : > { %3235 = shalt.err (!%p3232_p3)
}
  0xf4   : > { %2817 = dma.hbm_to_vmem [thread:$0]  (%p4844_p13), %s4097_s24, 16, %s681_s15, %s4791_s10  }
  0xf5   : > { %s2551_s27 = sshll.u32 %s4028_s20, 1  ;;  %s2657_s21 = sshll.u32 %s3670_s29, 5 }
  0xf6   : > { %s4846_s9 = sld [smem:[#allocation65_spill]]  ;;  %s712_s22 = scalar_lea.vmem [#allocation18], %s2551_s27 }
  0xf7   : > { %s720_s13 = sshll.u32 %s712_s22, 4  ;;  %s4792_s8 = scalar_lea.sflag [#allocation19], %s3998_s19  ;;  %s721_s13 = int_to_ptr.vmem [resolvable:$true] %s720_s13 }
  0xfc   : > { %s4125_s18 = scalar_lea.hbm %s4846_s9, %s2657_s21  ;;  %s3240_s10 = scalar_lea.hbm %s4846_s9, 64 }
  0xfd   : > { %s3236_s14 = scalar_lea.hbm %s4125_s18, 32  ;;  %p3241_p12 = scmp.lt.u32.totalorder %s4125_s18, %s4846_s9 }
  0xfe   : > { %p3237_p9 = scmp.ne.s32.totalorder %s4125_s18, %s3236_s14  ;;  %p3242_p2 = scmp.lt.u32.totalorder %s3240_s10, %s3236_s14 }
  0xff   : > { %p3244_p0 = scmp.lt.u32.totalorder %s3236_s14, %s4125_s18 }
 0x100   : > { %p3238_p7 = pnand %p3237_p9, %p4844_p13  ;;  %p3243_p11 = por %p3242_p2, %p3241_p12 }
 0x102   : > { %p3239_p10 = pneg %p3238_p7  ;;  %p3245_p1 = por %p3244_p0, %p3243_p11 }
 0x104   : > { %p3246_p5 = pnand %p3245_p1, %p3239_p10 }
 0x106   : > { %3249 = shalt.err (!%p3246_p5)
}
 0x107   : > { %s3250_s27 = scalar_lea.vmem %s721_s13, 32  ;;  %s3688_s12 = smov [#allocation18]  }
 0x108   : > { %p3251_p6 = scmp.ne.s32.totalorder %s721_s13, %s3250_s27  ;;  %s3254_s22 = sshll.u32 %s3688_s12, 4  ;;  %s3255_s22 = int_to_ptr.vmem [resolvable:$false] %s3254_s22 }
 0x109   : > { %s3256_s24 = scalar_lea.vmem %s3255_s22, 64  ;;  %p3257_p3 = scmp.lt.s32.totalorder %s721_s13, %s3255_s22 }
 0x10a   : > { %p3252_p4 = pnand %p3251_p6, %p4844_p13  ;;  %p3258_p9 = scmp.lt.s32.totalorder %s3256_s24, %s3250_s27 }
 0x10c   : > { %p3253_p8 = pneg %p3252_p4  ;;  %p3259_p7 = por %p3258_p9, %p3257_p3 }
 0x10e   : > { %p3260_p2 = pnand %p3259_p7, %p3253_p8 }
 0x110   : > { %3263 = shalt.err (!%p3260_p2)
}
 0x111   : > { %2819 = dma.hbm_to_vmem [thread:$0]  (%p4844_p13), %s4125_s18, 32, %s721_s13, %s4792_s8  }
 0x112   : > { %s4151_s15 = scalar_lea.hbm %s4751_s11, %s4033_s17  ;;  %s751_s25 = scalar_lea.vmem [#allocation21], %s4028_s20 }
 0x113   : > { %s758_s21 = sshll.u32 %s751_s25, 4  ;;  %s4795_s27 = scalar_lea.sflag [#allocation22], %s3998_s19  ;;  %s759_s21 = int_to_ptr.vmem [resolvable:$true] %s758_s21 }
 0x114   : > { %s3264_s12 = scalar_lea.hbm %s4151_s15, 16  ;;  %s3268_s13 = scalar_lea.hbm %s4751_s11, 32 }
 0x115   : > { %p3265_p10 = scmp.ne.s32.totalorder %s4151_s15, %s3264_s12  ;;  %p3269_p0 = scmp.lt.u32.totalorder %s4151_s15, %s4751_s11 }
 0x116   : > { %p3270_p1 = scmp.lt.u32.totalorder %s3268_s13, %s3264_s12  ;;  %p3272_p6 = scmp.lt.u32.totalorder %s3264_s12, %s4151_s15 }
 0x117   : > { %p3266_p12 = pnand %p3265_p10, %p4844_p13 }
 0x118   : > { %p3271_p5 = por %p3270_p1, %p3269_p0 }
 0x119   : > { %p3267_p11 = pneg %p3266_p12 }
 0x11a   : > { %p3273_p4 = por %p3272_p6, %p3271_p5 }
 0x11c   : > { %p3274_p8 = pnand %p3273_p4, %p3267_p11 }
 0x11e   : > { %3277 = shalt.err (!%p3274_p8)
}
 0x11f   : > { %s3278_s14 = scalar_lea.vmem %s759_s21, 16  ;;  %s3689_s25 = smov [#allocation21]  }
 0x120   : > { %p3279_p3 = scmp.ne.s32.totalorder %s759_s21, %s3278_s14  ;;  %s3282_s8 = sshll.u32 %s3689_s25, 4  ;;  %s3283_s8 = int_to_ptr.vmem [resolvable:$false] %s3282_s8 }
 0x121   : > { %s3284_s22 = scalar_lea.vmem %s3283_s8, 32  ;;  %p3285_p2 = scmp.lt.s32.totalorder %s759_s21, %s3283_s8 }
 0x122   : > { %p3280_p9 = pnand %p3279_p3, %p4844_p13  ;;  %p3286_p10 = scmp.lt.s32.totalorder %s3284_s22, %s3278_s14 }
 0x124   : > { %p3281_p7 = pneg %p3280_p9  ;;  %p3287_p12 = por %p3286_p10, %p3285_p2 }
 0x126   : > { %p3288_p0 = pnand %p3287_p12, %p3281_p7 }
 0x128   : > { %3291 = shalt.err (!%p3288_p0)
}
 0x129   : > { %2821 = dma.hbm_to_vmem [thread:$0]  (%p4844_p13), %s4151_s15, 16, %s759_s21, %s4795_s27  }
 0x12a   : > { %s2537_s12 = sshll.u32 %s3995_s4, 2  ;;  %s2538_s18 = sshll.u32 %s3674_s30, 6 }
 0x12b   : > { %s4847_s24 = sld [smem:[#allocation56_spill]]  ;;  %s544_s25 = scalar_lea.vmem [#allocation3], %s2537_s12 }
 0x12c   : > { %s551_s22 = sshll.u32 %s544_s25, 4  ;;  %s2800_s1 = smul.u32 192, %s4028_s20  ;;  %s4182_s22 = int_to_ptr.vmem [resolvable:$true] %s551_s22 }
 0x12d   : > { %s2801_s3 = smul.u32 3072, %s3670_s29  ;;  %s541_s5 = scalar_lea.sflag [#allocation4], %s3995_s4 }
 0x12e   : > { %p4849_p1 = scmp.ne.s32.totalorder %s4821_s28, 0 }
 0x131   : > { %s4848_s10 = smov %s4847_s24  ;;  %s4179_s14 = scalar_lea.hbm %s4847_s24, %s2538_s18 }
 0x132   : > { %s3292_s7 = scalar_lea.hbm %s4179_s14, 64  ;;  %s3296_s18 = scalar_lea.hbm %s4848_s10, 128 }
 0x133   : > { %p3293_p11 = scmp.ne.s32.totalorder %s4179_s14, %s3292_s7  ;;  %p3297_p4 = scmp.lt.u32.totalorder %s4179_s14, %s4848_s10 }
 0x134   : > { %p3298_p8 = scmp.lt.u32.totalorder %s3296_s18, %s3292_s7  ;;  %p3300_p9 = scmp.lt.u32.totalorder %s3292_s7, %s4179_s14 }
 0x135   : > { %p3294_p5 = pnand %p3293_p11, %p4849_p1 }
 0x136   : > { %p3299_p3 = por %p3298_p8, %p3297_p4 }
 0x137   : > { %p3295_p6 = pneg %p3294_p5 }
 0x138   : > { %p3301_p7 = por %p3300_p9, %p3299_p3 }
 0x13a   : > { %p3302_p2 = pnand %p3301_p7, %p3295_p6 }
 0x13c   : > { %3305 = shalt.err (!%p3302_p2)
}
 0x13d   : > { %s3306_s4 = scalar_lea.vmem %s4182_s22, 64  ;;  %s3690_s12 = smov [#allocation3]  }
 0x13e   : > { %p3307_p10 = scmp.ne.s32.totalorder %s4182_s22, %s3306_s4  ;;  %s3310_s24 = sshll.u32 %s3690_s12, 4  ;;  %s3311_s24 = int_to_ptr.vmem [resolvable:$false] %s3310_s24 }
 0x13f   : > { %s3312_s25 = scalar_lea.vmem %s3311_s24, 128  ;;  %p3313_p11 = scmp.lt.s32.totalorder %s4182_s22, %s3311_s24 }
 0x140   : > { %p3308_p12 = pnand %p3307_p10, %p4849_p1  ;;  %p3314_p5 = scmp.lt.s32.totalorder %s3312_s25, %s3306_s4 }
 0x142   : > { %p3309_p0 = pneg %p3308_p12  ;;  %p3315_p4 = por %p3314_p5, %p3313_p11 }
 0x144   : > { %p3316_p8 = pnand %p3315_p4, %p3309_p0 }
 0x146   : > { %3319 = shalt.err (!%p3316_p8)
}
 0x147   : > { %2810 = dma.hbm_to_vmem [thread:$0]  (%p4849_p1), %s4179_s14, 64, %s4182_s22, %s541_s5  }
 0x148   : > { %s4850_s2 = sld [smem:[#allocation58_spill]]  ;;  %s579_s18 = scalar_lea.vmem [#allocation8], %s2800_s1 }
 0x149   : > { %s586_s13 = sshll.u32 %s579_s18, 4  ;;  %s4216_s13 = int_to_ptr.vmem [resolvable:$true] %s586_s13 }
 0x14e   : > { %s4212_s21 = scalar_lea.hbm %s4850_s2, %s2801_s3  ;;  %s3324_s22 = scalar_lea.hbm %s4850_s2, 6144 }
 0x14f   : > { %s3320_s28 = scalar_lea.hbm %s4212_s21, 3072  ;;  %p3325_p9 = scmp.lt.u32.totalorder %s4212_s21, %s4850_s2 }
 0x150   : > { %p3321_p6 = scmp.ne.s32.totalorder %s4212_s21, %s3320_s28  ;;  %p3326_p7 = scmp.lt.u32.totalorder %s3324_s22, %s3320_s28 }
 0x151   : > { %p3328_p10 = scmp.lt.u32.totalorder %s3320_s28, %s4212_s21 }
 0x152   : > { %p3322_p3 = pnand %p3321_p6, %p4844_p13  ;;  %p3327_p2 = por %p3326_p7, %p3325_p9 }
 0x154   : > { %p3323_p1 = pneg %p3322_p3  ;;  %p3329_p12 = por %p3328_p10, %p3327_p2 }
 0x156   : > { %p3330_p0 = pnand %p3329_p12, %p3323_p1 }
 0x158   : > { %3333 = shalt.err (!%p3330_p0)
}
 0x159   : > { %s3334_s1 = scalar_lea.vmem %s4216_s13, 3072  ;;  %s3691_s4 = smov [#allocation8]  }
 0x15a   : > { %p3335_p11 = scmp.ne.s32.totalorder %s4216_s13, %s3334_s1  ;;  %s3338_s12 = sshll.u32 %s3691_s4, 4  ;;  %s3339_s12 = int_to_ptr.vmem [resolvable:$false] %s3338_s12 }
 0x15b   : > { %s3340_s24 = scalar_lea.vmem %s3339_s12, 6144  ;;  %p3341_p8 = scmp.lt.s32.totalorder %s4216_s13, %s3339_s12 }
 0x15c   : > { %p3336_p5 = pnand %p3335_p11, %p4844_p13  ;;  %p3342_p6 = scmp.lt.s32.totalorder %s3340_s24, %s3334_s1 }
 0x15e   : > { %p3337_p4 = pneg %p3336_p5  ;;  %p3343_p3 = por %p3342_p6, %p3341_p8 }
 0x160   : > { %p3344_p9 = pnand %p3343_p3, %p3337_p4 }
 0x162   : > { %3347 = shalt.err (!%p3344_p9)
}
 0x163   : > { %s3692_s25 = smov 192   ;;  %s3693_s7 = smov 12  }
 0x164   : > { %s4851_s15 = scalar_lea.sflag [#allocation7], %s3998_s19  ;;  %s2542_s18 = sshll.u32 %s4028_s20, 6 }
 0x165   : > { %2812 = dma.hbm_to_vmem [thread:$0]  (%p4844_p13), %s4212_s21, 3072, %s4216_s13, %s4851_s15, %s3692_s25, %s3692_s25, %s3693_s7  }
 0x166   : > { %s2655_s28 = sshll.u32 %s3670_s29, 10  ;;  %s4852_s22 = sld [smem:[#allocation60_spill]] }
 0x167   : > { %s619_s1 = scalar_lea.vmem [#allocation11], %s2542_s18 }
 0x168   : > { %s626_s4 = sshll.u32 %s619_s1, 4  ;;  %s4248_s4 = int_to_ptr.vmem [resolvable:$true] %s626_s4 }
 0x16c   : > { %s4853_s3 = smov %s4852_s22  ;;  %s4246_s8 = scalar_lea.hbm %s4852_s22, %s2655_s28 }
 0x16d   : > { %s3348_s12 = scalar_lea.hbm %s4246_s8, 1024  ;;  %s3352_s24 = scalar_lea.hbm %s4853_s3, 2048 }
 0x16e   : > { %p3349_p1 = scmp.ne.s32.totalorder %s4246_s8, %s3348_s12  ;;  %p3353_p10 = scmp.lt.u32.totalorder %s4246_s8, %s4853_s3 }
 0x16f   : > { %p3354_p12 = scmp.lt.u32.totalorder %s3352_s24, %s3348_s12  ;;  %p3356_p11 = scmp.lt.u32.totalorder %s3348_s12, %s4246_s8 }
 0x170   : > { %p3350_p7 = pnand %p3349_p1, %p4844_p13 }
 0x171   : > { %p3355_p0 = por %p3354_p12, %p3353_p10 }
 0x172   : > { %p3351_p2 = pneg %p3350_p7 }
 0x173   : > { %p3357_p5 = por %p3356_p11, %p3355_p0 }
 0x175   : > { %p3358_p4 = pnand %p3357_p5, %p3351_p2 }
 0x177   : > { %3361 = shalt.err (!%p3358_p4)
}
 0x178   : > { %s3362_s15 = scalar_lea.vmem %s4248_s4, 1024  ;;  %s3694_s18 = smov [#allocation11]  }
 0x179   : > { %p3363_p8 = scmp.ne.s32.totalorder %s4248_s4, %s3362_s15  ;;  %s3366_s28 = sshll.u32 %s3694_s18, 4  ;;  %s3367_s28 = int_to_ptr.vmem [resolvable:$false] %s3366_s28 }
 0x17a   : > { %s3368_s5 = scalar_lea.vmem %s3367_s28, 2048  ;;  %p3369_p9 = scmp.lt.s32.totalorder %s4248_s4, %s3367_s28 }
 0x17b   : > { %p3364_p6 = pnand %p3363_p8, %p4844_p13  ;;  %p3370_p1 = scmp.lt.s32.totalorder %s3368_s5, %s3362_s15 }
 0x17d   : > { %p3365_p3 = pneg %p3364_p6  ;;  %p3371_p7 = por %p3370_p1, %p3369_p9 }
 0x17f   : > { %p3372_p10 = pnand %p3371_p7, %p3365_p3 }
 0x181   : > { %3375 = shalt.err (!%p3372_p10)
}
 0x182   : > { %s4794_s14 = smov 64   ;;  %s4796_s22 = smov 4  }
 0x183   : > { %s4854_s1 = scalar_lea.sflag [#allocation10], %s3998_s19  ;;  %s4855_s13 = sld [smem:[#allocation62_spill]] }
 0x184   : > { %2814 = dma.hbm_to_vmem [thread:$0]  (%p4844_p13), %s4246_s8, 1024, %s4248_s4, %s4854_s1, %s4794_s14, %s4794_s14, %s4796_s22  }
 0x185   : > { %s656_s25 = scalar_lea.vmem [#allocation14], %s4028_s20  ;;  %s2548_s15 = sshll.u32 %s4028_s20, 7 }
 0x186   : > { %s663_s7 = sshll.u32 %s656_s25, 4  ;;  %s664_s7 = int_to_ptr.vmem [resolvable:$true] %s663_s7 }
 0x189   : > { %s4280_s24 = scalar_lea.hbm %s4855_s13, %s4033_s17  ;;  %s3380_s4 = scalar_lea.hbm %s4855_s13, 32 }
 0x18a   : > { %s3376_s18 = scalar_lea.hbm %s4280_s24, 16  ;;  %p3381_p11 = scmp.lt.u32.totalorder %s4280_s24, %s4855_s13 }
 0x18b   : > { %p3377_p2 = scmp.ne.s32.totalorder %s4280_s24, %s3376_s18  ;;  %p3382_p5 = scmp.lt.u32.totalorder %s3380_s4, %s3376_s18 }
 0x18c   : > { %p3384_p8 = scmp.lt.u32.totalorder %s3376_s18, %s4280_s24 }
 0x18d   : > { %p3378_p12 = pnand %p3377_p2, %p4844_p13  ;;  %p3383_p4 = por %p3382_p5, %p3381_p11 }
 0x18f   : > { %p3379_p0 = pneg %p3378_p12  ;;  %p3385_p6 = por %p3384_p8, %p3383_p4 }
 0x191   : > { %p3386_p3 = pnand %p3385_p6, %p3379_p0 }
 0x193   : > { %3389 = shalt.err (!%p3386_p3)
}
 0x194   : > { %s3390_s12 = scalar_lea.vmem %s664_s7, 16  ;;  %s3697_s21 = smov [#allocation14]  }
 0x195   : > { %p3391_p9 = scmp.ne.s32.totalorder %s664_s7, %s3390_s12  ;;  %s3394_s25 = sshll.u32 %s3697_s21, 4  ;;  %s3395_s25 = int_to_ptr.vmem [resolvable:$false] %s3394_s25 }
 0x196   : > { %s3396_s28 = scalar_lea.vmem %s3395_s25, 32  ;;  %p3397_p10 = scmp.lt.s32.totalorder %s664_s7, %s3395_s25 }
 0x197   : > { %p3392_p1 = pnand %p3391_p9, %p4844_p13  ;;  %p3398_p2 = scmp.lt.s32.totalorder %s3396_s28, %s3390_s12 }
 0x199   : > { %p3393_p7 = pneg %p3392_p1  ;;  %p3399_p12 = por %p3398_p2, %p3397_p10 }
 0x19b   : > { %p3400_p5 = pnand %p3399_p12, %p3393_p7 }
 0x19d   : > { %3403 = shalt.err (!%p3400_p5)
}
 0x19e   : > { %s4856_s18 = scalar_lea.sflag [#allocation13], %s3998_s19  ;;  %s2656_s8 = sshll.u32 %s3670_s29, 11 }
 0x19f   : > { %2816 = dma.hbm_to_vmem [thread:$0]  (%p4844_p13), %s4280_s24, 16, %s664_s7, %s4856_s18  }
 0x1a0   : > { %s691_s4 = scalar_lea.vmem [#allocation17], %s2548_s15  ;;  %s4857_s21 = sld [smem:[#allocation64_spill]] }
 0x1a1   : > { %s698_s5 = sshll.u32 %s691_s4, 4  ;;  %s4313_s5 = int_to_ptr.vmem [resolvable:$true] %s698_s5 }
 0x1a6   : > { %s4858_s14 = smov %s4857_s21  ;;  %s4311_s25 = scalar_lea.hbm %s4857_s21, %s2656_s8 }
 0x1a7   : > { %s3404_s28 = scalar_lea.hbm %s4311_s25, 2048  ;;  %s3408_s18 = scalar_lea.hbm %s4858_s14, 4096 }
 0x1a8   : > { %p3405_p0 = scmp.ne.s32.totalorder %s4311_s25, %s3404_s28  ;;  %p3409_p8 = scmp.lt.u32.totalorder %s4311_s25, %s4858_s14 }
 0x1a9   : > { %p3410_p6 = scmp.lt.u32.totalorder %s3408_s18, %s3404_s28  ;;  %p3412_p9 = scmp.lt.u32.totalorder %s3404_s28, %s4311_s25 }
 0x1aa   : > { %p3406_p11 = pnand %p3405_p0, %p4844_p13 }
 0x1ab   : > { %p3411_p3 = por %p3410_p6, %p3409_p8 }
 0x1ac   : > { %p3407_p4 = pneg %p3406_p11 }
 0x1ad   : > { %p3413_p1 = por %p3412_p9, %p3411_p3 }
 0x1af   : > { %p3414_p7 = pnand %p3413_p1, %p3407_p4 }
 0x1b1   : > { %3417 = shalt.err (!%p3414_p7)
}
 0x1b2   : > { %s3418_s1 = scalar_lea.vmem %s4313_s5, 2048  ;;  %s3698_s12 = smov [#allocation17]  }
 0x1b3   : > { %p3419_p10 = scmp.ne.s32.totalorder %s4313_s5, %s3418_s1  ;;  %s3422_s21 = sshll.u32 %s3698_s12, 4  ;;  %s3423_s21 = int_to_ptr.vmem [resolvable:$false] %s3422_s21 }
 0x1b4   : > { %s3424_s27 = scalar_lea.vmem %s3423_s21, 4096  ;;  %p3425_p5 = scmp.lt.s32.totalorder %s4313_s5, %s3423_s21 }
 0x1b5   : > { %p3420_p2 = pnand %p3419_p10, %p4844_p13  ;;  %p3426_p0 = scmp.lt.s32.totalorder %s3424_s27, %s3418_s1 }
 0x1b7   : > { %p3421_p12 = pneg %p3420_p2  ;;  %p3427_p11 = por %p3426_p0, %p3425_p5 }
 0x1b9   : > { %p3428_p8 = pnand %p3427_p11, %p3421_p12 }
 0x1bb   : > { %3431 = shalt.err (!%p3428_p8)
}
 0x1bc   : > { %s3699_s28 = smov 128   ;;  %s3700_s24 = smov 8  }
 0x1bd   : > { %s4859_s7 = scalar_lea.sflag [#allocation16], %s3998_s19  ;;  %s4860_s1 = sld [smem:[#allocation66_spill]] }
 0x1be   : > { %2818 = dma.hbm_to_vmem [thread:$0]  (%p4844_p13), %s4311_s25, 2048, %s4313_s5, %s4859_s7, %s3699_s28, %s3699_s28, %s3700_s24  }
 0x1bf   : > { %s731_s21 = scalar_lea.vmem [#allocation20], %s2548_s15  ;;  %s4861_s3 = sld [smem:[#allocation67_spill]] }
 0x1c0   : > { %s738_s27 = sshll.u32 %s731_s21, 4  ;;  %s4347_s27 = int_to_ptr.vmem [resolvable:$true] %s738_s27 }
 0x1c3   : > { %s4343_s12 = scalar_lea.hbm %s4860_s1, %s2656_s8  ;;  %s3436_s28 = scalar_lea.hbm %s4860_s1, 4096 }
 0x1c4   : > { %s3432_s5 = scalar_lea.hbm %s4343_s12, 2048  ;;  %p3437_p9 = scmp.lt.u32.totalorder %s4343_s12, %s4860_s1 }
 0x1c5   : > { %s4353_s9 = scalar_lea.hbm %s4861_s3, %s4033_s17  ;;  %p3433_p4 = scmp.ne.s32.totalorder %s4343_s12, %s3432_s5 }
 0x1c6   : > { %p3438_p1 = scmp.lt.u32.totalorder %s3436_s28, %s3432_s5  ;;  %p3440_p10 = scmp.lt.u32.totalorder %s3432_s5, %s4343_s12 }
 0x1c7   : > { %p3434_p6 = pnand %p3433_p4, %p4844_p13 }
 0x1c8   : > { %p3439_p7 = por %p3438_p1, %p3437_p9 }
 0x1c9   : > { %p3435_p3 = pneg %p3434_p6 }
 0x1ca   : > { %p3441_p2 = por %p3440_p10, %p3439_p7 }
 0x1cc   : > { %p3442_p12 = pnand %p3441_p2, %p3435_p3 }
 0x1ce   : > { %3445 = shalt.err (!%p3442_p12)
}
 0x1cf   : > { %s3446_s2 = scalar_lea.vmem %s4347_s27, 2048  ;;  %s3701_s22 = smov [#allocation20]  }
 0x1d0   : > { %p3447_p5 = scmp.ne.s32.totalorder %s4347_s27, %s3446_s2  ;;  %s3450_s15 = sshll.u32 %s3701_s22, 4  ;;  %s3451_s15 = int_to_ptr.vmem [resolvable:$false] %s3450_s15 }
 0x1d1   : > { %s3452_s18 = scalar_lea.vmem %s3451_s15, 4096  ;;  %p3453_p8 = scmp.lt.s32.totalorder %s4347_s27, %s3451_s15 }
 0x1d2   : > { %p3448_p0 = pnand %p3447_p5, %p4844_p13  ;;  %p3454_p4 = scmp.lt.s32.totalorder %s3452_s18, %s3446_s2 }
 0x1d4   : > { %p3449_p11 = pneg %p3448_p0  ;;  %p3455_p6 = por %p3454_p4, %p3453_p8 }
 0x1d6   : > { %p3456_p9 = pnand %p3455_p6, %p3449_p11 }
 0x1d8   : > { %3459 = shalt.err (!%p3456_p9)
}
 0x1d9   : > { %s4862_s4 = smov 4   ;;  %s4863_s21 = smov 64  }
 0x1da   : > { %s4864_s5 = scalar_lea.sflag [#allocation19], %s3998_s19  ;;  %s768_s8 = scalar_lea.vmem [#allocation23], %s4028_s20 }
 0x1db   : > { %2820 = dma.hbm_to_vmem [thread:$0]  (%p4844_p13), %s4343_s12, 2048, %s4347_s27, %s4864_s5, %s4863_s21, %s4863_s21, %s4862_s4  }
 0x1dc   : > { %s775_s25 = sshll.u32 %s768_s8, 4  ;;  %s3460_s28 = scalar_lea.hbm %s4353_s9, 16  ;;  %s776_s25 = int_to_ptr.vmem [resolvable:$true] %s775_s25 }
 0x1dd   : > { %p3461_p3 = scmp.ne.s32.totalorder %s4353_s9, %s3460_s28  ;;  %s3464_s2 = scalar_lea.hbm %s4861_s3, 32 }
 0x1de   : > { %p3465_p10 = scmp.lt.u32.totalorder %s4353_s9, %s4861_s3  ;;  %p3466_p2 = scmp.lt.u32.totalorder %s3464_s2, %s3460_s28 }
 0x1df   : > { %p3462_p1 = pnand %p3461_p3, %p4844_p13  ;;  %p3468_p5 = scmp.lt.u32.totalorder %s3460_s28, %s4353_s9 }
 0x1e0   : > { %p3467_p12 = por %p3466_p2, %p3465_p10 }
 0x1e1   : > { %p3463_p7 = pneg %p3462_p1 }
 0x1e2   : > { %p3469_p0 = por %p3468_p5, %p3467_p12 }
 0x1e4   : > { %p3470_p11 = pnand %p3469_p0, %p3463_p7 }
 0x1e6   : > { %3473 = shalt.err (!%p3470_p11)
}
 0x1e7   : > { %s3474_s12 = scalar_lea.vmem %s776_s25, 16  ;;  %s3702_s27 = smov [#allocation23]  }
 0x1e8   : > { %p3475_p8 = scmp.ne.s32.totalorder %s776_s25, %s3474_s12  ;;  %s3478_s18 = sshll.u32 %s3702_s27, 4  ;;  %s3479_s18 = int_to_ptr.vmem [resolvable:$false] %s3478_s18 }
 0x1e9   : > { %s3480_s4 = scalar_lea.vmem %s3479_s18, 32  ;;  %p3481_p9 = scmp.lt.s32.totalorder %s776_s25, %s3479_s18 }
 0x1ea   : > { %p3476_p4 = pnand %p3475_p8, %p4844_p13  ;;  %p3482_p3 = scmp.lt.s32.totalorder %s3480_s4, %s3474_s12 }
 0x1ec   : > { %p3477_p6 = pneg %p3476_p4  ;;  %p3483_p1 = por %p3482_p3, %p3481_p9 }
 0x1ee   : > { %p3484_p2 = pnand %p3483_p1, %p3477_p6 }
 0x1f0   : > { %3487 = shalt.err (!%p3484_p2)
}
 0x1f1   : > { %s4865_s21 = scalar_lea.sflag [#allocation22], %s3998_s19  ;;  %s4866_s28 = sld [smem:[#allocation68_spill]] }
 0x1f2   : > { %2822 = dma.hbm_to_vmem [thread:$0]  (%p4844_p13), %s4353_s9, 16, %s776_s25, %s4865_s21  }
 0x1f3   : > { %s785_s2 = scalar_lea.vmem [#allocation24], %s4028_s20  ;;  %s783_s15 = scalar_lea.sflag [#allocation25], %s3998_s19 }
 0x1f4   : > { %s792_s22 = sshll.u32 %s785_s2, 4  ;;  %s793_s22 = int_to_ptr.vmem [resolvable:$true] %s792_s22 }
 0x1f7   : > { %s4867_s7 = smov %s4866_s28  ;;  %s4405_s24 = scalar_lea.hbm %s4866_s28, %s4033_s17 }
 0x1f8   : > { %s3488_s12 = scalar_lea.hbm %s4405_s24, 16  ;;  %s3492_s25 = scalar_lea.hbm %s4867_s7, 32 }
 0x1f9   : > { %p3489_p7 = scmp.ne.s32.totalorder %s4405_s24, %s3488_s12  ;;  %p3493_p5 = scmp.lt.u32.totalorder %s4405_s24, %s4867_s7 }
 0x1fa   : > { %p3494_p0 = scmp.lt.u32.totalorder %s3492_s25, %s3488_s12  ;;  %p3496_p8 = scmp.lt.u32.totalorder %s3488_s12, %s4405_s24 }
 0x1fb   : > { %p3490_p10 = pnand %p3489_p7, %p4844_p13 }
 0x1fc   : > { %p3495_p11 = por %p3494_p0, %p3493_p5 }
 0x1fd   : > { %p3491_p12 = pneg %p3490_p10 }
 0x1fe   : > { %p3497_p4 = por %p3496_p8, %p3495_p11 }
 0x200   : > { %p3498_p6 = pnand %p3497_p4, %p3491_p12 }
 0x202   : > { %3501 = shalt.err (!%p3498_p6)
}
 0x203   : > { %s3502_s19 = scalar_lea.vmem %s793_s22, 16  ;;  %s3703_s20 = smov [#allocation24]  }
 0x204   : > { %p3503_p9 = scmp.ne.s32.totalorder %s793_s22, %s3502_s19  ;;  %s3506_s4 = sshll.u32 %s3703_s20, 4  ;;  %s3507_s4 = int_to_ptr.vmem [resolvable:$false] %s3506_s4 }
 0x205   : > { %s3508_s21 = scalar_lea.vmem %s3507_s4, 32  ;;  %p3509_p2 = scmp.lt.s32.totalorder %s793_s22, %s3507_s4 }
 0x206   : > { %p3504_p3 = pnand %p3503_p9, %p4844_p13  ;;  %p3510_p7 = scmp.lt.s32.totalorder %s3508_s21, %s3502_s19 }
 0x208   : > { %p3505_p1 = pneg %p3504_p3  ;;  %p3511_p10 = por %p3510_p7, %p3509_p2 }
 0x20a   : > { %p3512_p0 = pnand %p3511_p10, %p3505_p1 }
 0x20c   : > { %3515 = shalt.err (!%p3512_p0)
}
 0x20d   : > { %2823 = dma.hbm_to_vmem [thread:$0]  (%p4844_p13), %s4405_s24, 16, %s793_s22, %s783_s15  }
 0x20e PF: > { %p4868_p12 = scmp.ne.s32.totalorder %s4836_s16, 0 }
 0x20f   : > { %s4869_s5 = sld [smem:[#allocation44_spill]] (!%p4868_p12)  ;;  %s4870_s8 = sld [smem:[#allocation50_spill]] (!%p4868_p12) }
 0x210   : > { %801 = sbr.rel (%p4868_p12) target bundleno = 3803 (0xedb), region = 84 }
 0x215   : > { %s4429_s28 = sand.u32 (!%p4868_p12), 1, %s4869_s5   ;;  %p4871_p5 = scmp.ne.s32.totalorder (!%p4868_p12), %s4870_s8, 0 }
 0x216   : > { %s2561_s2 = sshll.u32 (!%p4868_p12), %s4429_s28, 2  ;;  %s804_s12 = scalar_lea.sflag (!%p4868_p12), [#allocation4], %s4429_s28 }
 0x217   : > { %s4433_s27 = scalar_lea.vmem [#allocation3], %s2561_s2 }
 0x218   : > { %3589 = dma.done.wait (%p4871_p5), %s804_s12, 64  }
 0x219   : > { %3591 = vsyncadd (%p4871_p5), %s804_s12, 4294967232  ;;  %s4872_s6 = sld [smem:[#allocation47_spill]] }
 0x21f   : > { %s4440_s16 = sand.u32 1, %s4872_s6  }
 0x220   : > { %s813_s24 = scalar_lea.sflag [#allocation7], %s4440_s16 }
 0x221   : > { %3593 = dma.done.wait (%p4871_p5), %s813_s24, 16  }
 0x222   : > { %3595 = vsyncadd (%p4871_p5), %s813_s24, 4294967280  ;;  %s4873_s15 = sld [smem:[#allocation42_spill]]  ;;  %s4874_s9 = sld [smem:[#allocation53_spill]] }
 0x228   : > { %s4449_s25 = sand.u32 1, %s4873_s15   ;;  %p4875_p13 = scmp.ne.s32.totalorder %s4874_s9, 0 }
 0x229   : > { %s2804_s18 = smul.u32 192, %s4449_s25 }
 0x22b   : > { %s4452_s17 = scalar_lea.vmem [#allocation8], %s2804_s18 }
 0x22c   : > { %3597 = dma.done.wait (%p4875_p13), %s813_s24, 3072  }
 0x22d   : > { %3599 = vsyncadd (%p4875_p13), %s813_s24, 4294964224  ;;  %s2805_s19 = smul.u32 3, %s4449_s25  ;;  %s830_s20 = scalar_lea.sflag [#allocation10], %s4440_s16 }
 0x22f   : > { %s4460_s4 = scalar_lea.vmem [#allocation9], %s2805_s19 }
 0x230   : > { %3601 = dma.done.wait (%p4875_p13), %s830_s20, 1072  }
 0x231   : > { %3603 = vsyncadd (%p4875_p13), %s830_s20, 4294966224  ;;  %s2562_s21 = sshll.u32 %s4449_s25, 6  ;;  %s848_s8 = scalar_lea.sflag [#allocation13], %s4440_s16 }
 0x232   : > { %s4467_s5 = scalar_lea.vmem [#allocation11], %s2562_s21 }
 0x233   : > { %3605 = dma.done.wait (%p4875_p13), %s848_s8, 32  }
 0x234   : > { %3607 = vsyncadd (%p4875_p13), %s848_s8, 4294967264  ;;  %s864_s24 = scalar_lea.sflag [#allocation16], %s4440_s16 }
 0x235   : > { %3609 = dma.done.wait (%p4875_p13), %s864_s24, 2064  }
 0x236   : > { %3611 = vsyncadd (%p4875_p13), %s864_s24, 4294965232  ;;  %s2563_s18 = sshll.u32 %s4449_s25, 7  ;;  %s2564_s19 = sshll.u32 %s4449_s25, 1 }
 0x237   : > { %s4484_s20 = scalar_lea.vmem [#allocation17], %s2563_s18  ;;  %s881_s21 = scalar_lea.sflag [#allocation19], %s4440_s16 }
 0x238   : > { %s4487_s8 = scalar_lea.vmem [#allocation18], %s2564_s19 }
 0x239   : > { %3613 = dma.done.wait (%p4875_p13), %s881_s21, 2080  }
 0x23a   : > { %3615 = vsyncadd (%p4875_p13), %s881_s21, 4294965216  ;;  %s4493_s24 = scalar_lea.vmem [#allocation20], %s2563_s18  ;;  %s899_s15 = scalar_lea.sflag [#allocation22], %s4440_s16 }
 0x23b   : > { %s901_s12 = scalar_lea.vmem [#allocation21], %s4449_s25 }
 0x23c   : > { %3617 = dma.done.wait (%p4875_p13), %s899_s15, 32  }
 0x23d   : > { %3619 = vsyncadd (%p4875_p13), %s899_s15, 4294967264  ;;  %s909_s19 = scalar_lea.vmem [#allocation23], %s4449_s25  ;;  %s915_s2 = scalar_lea.sflag [#allocation25], %s4440_s16 }
 0x23e   : > { %s917_s22 = scalar_lea.vmem [#allocation24], %s4449_s25 }
 0x23f   : > { %3621 = dma.done.wait (%p4875_p13), %s915_s2, 16  }
 0x240   : > { %3623 = vsyncadd (%p4875_p13), %s915_s2, 4294967280  ;;  %p4876_p11 = scmp.eq.s32.totalorder %s4872_s6, 0 }
 0x242   : > { %3625 = dma.done.wait (%p4876_p11), [#allocation25], 1024   ;;  %p4877_p8 = pmov %p4876_p11 }
 0x244   : > { %3627 = vsyncadd (%p4877_p8), [#allocation25], 4294966272  ;;  %p4878_p4 = pmov %p4877_p8 }
 0x246   : > { %3629 = dma.done.wait (%p4878_p4), [#allocation28], 16   ;;  %p4879_p6 = pmov %p4878_p4 }
 0x247   : > { %s1030_s16 = scalar_lea.vmem [#allocation29], %s4429_s28  ;;  %s4880_s15 = sld [smem:[#allocation45_spill]] }
 0x248   : > { %3631 = vsyncadd (%p4879_p6), [#allocation28], 4294967280 }
 0x24d   : > { %p2568_p9 = scmp.ne.s32.totalorder %s4880_s15, 0 }
 0x24e   : > { %v1036_v0 = vld [vmem:[%s4433_s27] sm:$0xf] (!%p2568_p9) }
 0x24f   : > { %1035 = sbr.rel (%p2568_p9) target bundleno = 598 (0x256), region = 152  ;;  %1037 = vst [vmem:[#allocation2] sm:$0xf] (!%p2568_p9), %v1036_v0 }
 0x256 PF: > { %v2964_v1 = vld [vmem:[%s4452_s17 + $0x4] ss:$12 sps:$4 sm:$0xff]   ;;  %v2966_v2 = vld [vmem:[%s4452_s17] ss:$12 sps:$4 sm:$0xff]   ;;  %v3704_v3 = vmov 0   ;;  %v3705_v4 = vmov 0.0   ;;  %v1076_v28 = vlaneseq }
 0x257   : > { %1251 = vmatprep.mubr.bf16.mxu0 %v3704_v3  ;;  %2716 = vmatprep.subr.bf16.mxu1 %v3705_v4  ;;  %v2967_v5 = vld [vmem:[%s4452_s17 + $0x1c] ss:$12 sps:$4 sm:$0xff]   ;;  %v2969_v6 = vld [vmem:[%s4452_s17 + $0x18] ss:$12 sps:$4 sm:$0xff]   ;;  %v2970_v7 = vld [vmem:[%s4452_s17 + $0x34] ss:$12 sps:$4 sm:$0xff]  }
 0x258   : > { %1219 = vmatprep.subr.bf16.mxu0 %v2964_v1  ;;  %v2972_v8 = vld [vmem:[%s4452_s17 + $0x30] ss:$12 sps:$4 sm:$0xff]   ;;  %v2973_v9 = vld [vmem:[%s4452_s17 + $0x4c] ss:$12 sps:$4 sm:$0xff]   ;;  %v2975_v10 = vld [vmem:[%s4452_s17 + $0x48] ss:$12 sps:$4 sm:$0xff]  }
 0x259   : > { %1220 = vmatpush1.bf16.msra.mxu0 %v2966_v2  ;;  %v2988_v11 = vld [vmem:[%s4452_s17 + $0x8] ss:$12 sps:$4 sm:$0xff]   ;;  %v2976_v12 = vld [vmem:[%s4452_s17 + $0x64] ss:$12 sps:$4 sm:$0xff]   ;;  %v2989_v13 = vld [vmem:[%s4452_s17 + $0x20] ss:$12 sps:$4 sm:$0xff]  }
 0x25a   : > { %1221 = vmatprep.subr.bf16.mxu0 %v2967_v5  ;;  %2717 = vmatpush3.bf16.msra.mxu1 %v2988_v11  ;;  %v2978_v14 = vld [vmem:[%s4452_s17 + $0x60] ss:$12 sps:$4 sm:$0xff]   ;;  %v2979_v15 = vld [vmem:[%s4452_s17 + $0x7c] ss:$12 sps:$4 sm:$0xff]   ;;  %v2981_v16 = vld [vmem:[%s4452_s17 + $0x78] ss:$12 sps:$4 sm:$0xff]  }
 0x25b   : > { %2718 = vmatprep.subr.bf16.mxu1 %v3705_v4  ;;  %v2990_v17 = vld [vmem:[%s4452_s17 + $0x38] ss:$12 sps:$4 sm:$0xff]   ;;  %v2982_v18 = vld [vmem:[%s4452_s17 + $0x94] ss:$12 sps:$4 sm:$0xff]   ;;  %v2991_v19 = vld [vmem:[%s4452_s17 + $0x50] ss:$12 sps:$4 sm:$0xff]  }
 0x25c   : > { %v2984_v20 = vld [vmem:[%s4452_s17 + $0x90] ss:$12 sps:$4 sm:$0xff]   ;;  %v2985_v21 = vld [vmem:[%s4452_s17 + $0xac] ss:$12 sps:$4 sm:$0xff]   ;;  %v2992_v22 = vld [vmem:[%s4452_s17 + $0x68] ss:$12 sps:$4 sm:$0xff]  }
 0x25d   : > { %1222 = vmatpush1.bf16.msra.mxu0 %v2969_v6  ;;  %v2987_v23 = vld [vmem:[%s4452_s17 + $0xa8] ss:$12 sps:$4 sm:$0xff]   ;;  %v2993_v24 = vld [vmem:[%s4452_s17 + $0x80] ss:$12 sps:$4 sm:$0xff]   ;;  %v2994_v26 = vld [vmem:[%s4452_s17 + $0x98] ss:$12 sps:$4 sm:$0xff]  }
 0x25e   : > { %1223 = vmatprep.subr.bf16.mxu0 %v2970_v7  ;;  %2719 = vmatpush3.bf16.msra.mxu1 %v2989_v13  ;;  %v4547_v25 = vld [vmem:[#allocation2] sm:$0xf]  ;;  %vm3706_vm0 = vmmov 0   ;;  %v4564_v29 = vshrl.u32 %v1076_v28, 7  ;;  %v1074_v31 = vld [vmem:[%s4460_s4] sm:$0x7] }
 0x25f   : > { %2720 = vmatprep.subr.bf16.mxu1 %v3705_v4  ;;  %v2995_v27 = vld [vmem:[%s4452_s17 + $0xb0] ss:$12 sps:$4 sm:$0xff]   ;;  %2732 = vmatprep.mubr.msk.bf16.mxu1 %vm3706_vm0, %v3705_v4  ;;  %vm1309_vm1 = vcmask 523264   ;;  %s3707_s27 = smov 64   ;;  %vm1372_vm2 = vcmask 1043456   ;;  %s4881_s6 = scalar_lea.vmem [#allocation6], %s4429_s28 }
 0x260   : > { %v1082_v30 = vsub.s32 1, %v4564_v29  ;;  %v4569_v32 = vsub.s32 0, %v4564_v29  ;;  %v1086_v44 = vsub.s32 2, %v4564_v29  ;;  %v1039_v53 = vld [vmem:[%s4881_s6] sm:$0x1]  ;;  %vm1356_vm3 = vcmask 64512  }
 0x261   : > { %1224 = vmatpush1.bf16.msra.mxu0 %v2972_v8  ;;  %v1040_v54 = vsub.f32 1.0, %v1039_v53  ;;  %s4882_s9 = scalar_lea.vmem [#allocation12], %s4449_s25  ;;  %s4883_s17 = scalar_lea.vmem [#allocation14], %s4449_s25 }
 0x262   : > { %1225 = vmatprep.subr.bf16.mxu0 %v2973_v9  ;;  %2721 = vmatpush3.bf16.msra.mxu1 %v2990_v17  ;;  %v1083_v33 = vrot.slane %v1074_v31, %v1082_v30  ;;  %v1079_v34 = vrot.slane %v1074_v31, %v4569_v32  ;;  %v1087_v45 = vrot.slane %v1074_v31, %v1086_v44  ;;  %v3003_v44 = vld [vmem:[%s4467_s5 + $0x38] sm:$0xff]   ;;  %s4884_s4 = scalar_lea.vmem [#allocation15], %s4449_s25 }
 0x263   : > { %2722 = vmatprep.subr.bf16.mxu1 %v3705_v4  ;;  %v1041_v55 = vmul.f32 -1e+09, %v1040_v54 }
 0x265   : > { %1226 = vmatpush1.bf16.msra.mxu0 %v2975_v10  ;;  %v1307_v56 = vrot.slane %v1041_v55, %v4569_v32 }
 0x266   : > { %1227 = vmatprep.subr.bf16.mxu0 %v2976_v12  ;;  %2723 = vmatpush3.bf16.msra.mxu1 %v2991_v19 }
 0x267   : > { %2724 = vmatprep.subr.bf16.mxu1 %v3705_v4 }
 0x269   : > { %1228 = vmatpush1.bf16.msra.mxu0 %v2978_v14 }
 0x26a   : > { %1229 = vmatprep.subr.bf16.mxu0 %v2979_v15  ;;  %2725 = vmatpush3.bf16.msra.mxu1 %v2992_v22 }
 0x26b   : > { %2726 = vmatprep.subr.bf16.mxu1 %v3705_v4 }
 0x26d   : > { %1230 = vmatpush1.bf16.msra.mxu0 %v2981_v16 }
 0x26e   : > { %1231 = vmatprep.subr.bf16.mxu0 %v2982_v18  ;;  %2727 = vmatpush3.bf16.msra.mxu1 %v2993_v24 }
 0x26f   : > { %2728 = vmatprep.subr.bf16.mxu1 %v3705_v4 }
 0x271   : > { %1232 = vmatpush1.bf16.msra.mxu0 %v2984_v20 }
 0x272   : > { %1233 = vmatprep.subr.bf16.mxu0 %v2985_v21  ;;  %2729 = vmatpush3.bf16.msra.mxu1 %v2994_v26 }
 0x273   : > { %2730 = vmatprep.subr.bf16.mxu1 %v3705_v4 }
 0x275   : > { %1234 = vmatpush1.bf16.msra.mxu0 %v2987_v23 }
 0x276   : > { %2760 = vmatprep.subr.bf16.mxu0 %v3705_v4  ;;  %2731 = vmatpush3.bf16.msra.mxu1 %v2995_v27 }
 0x277   : > { %2736 = vmatprep.subr.bf16.mxu1 %v3705_v4 }
 0x278   : > { %1252 = vmatmul.mubr.bf16.vlgmr.msra.gmra.mrb[0].mxu0 %v4547_v25 }
 0x279   : > { %2776 = vmatprep.mubr.msk.bf16.mxu0 %vm3706_vm0, %v3705_v4  ;;  %2733 = vmatmul.mubr.bf16.vlgmr.msra.gmra.mrb[0].mxu1 %v4547_v25 }
 0x27a   : > { %2738 = vmatprep.mubr.msk.bf16.mxu1 %vm3706_vm0, %v3705_v4 }
 0x34b   : > { %v1253_v35 = vpop.f32.mrb[0].mxu0 }
 0x34c   : > { %v1255_v36 = vpop.f32.mrb[1].mxu0  ;;  %v1254_v40 = vadd.f32 %v1253_v35, %v1079_v34  ;;  %v1294_v46 = vpop.f32.mrb[0].mxu1 }
 0x34d   : > { %v1256_v37 = vadd.f32 %v1255_v36, %v1083_v33  ;;  %v1257_v38 = vpop.f32.mrb[2].mxu0  ;;  %v1295_v47 = vadd.f32 %v1294_v46, %v1087_v45  ;;  %v2734_v48 = vpop.f32.mrb[1].mxu1 }
 0x34e   : > { %v1258_v39 = vpop.f32.mrb[3].mxu0  ;;  %v1300_v43 = vpack.c.bf16 %v1254_v40, %v1254_v40  ;;  %v1297_v49 = vpop.f32.mrb[2].mxu1  ;;  %v2996_v38 = vld [vmem:[%s4467_s5] sm:$0xff]   ;;  %v2998_v40 = vld [vmem:[%s4467_s5 + $0x10] sm:$0xff]  }
 0x34f   : > { %v1301_v41 = vpack.c.bf16 %v1256_v37, %v1256_v37  ;;  %v1302_v50 = vpack.c.bf16 %v1295_v47, %v1295_v47  ;;  %v2735_v51 = vpop.f32.mrb[3].mxu1  ;;  %2761 = vmatpush3.bf16.msra.mxu0 %v2996_v38  ;;  %v2997_v39 = vld [vmem:[%s4467_s5 + $0x8] sm:$0xff]  }
 0x350   : > { %2762 = vmatprep.subr.bf16.mxu0 %v3705_v4  ;;  %v3036_v38 = vld [vmem:[%s4493_s24 + $0x60] sm:$0xff]  }
 0x351   : > { %v1314_v42 = vsel %vm1309_vm1, %v1301_v41, 0  ;;  %1420 = vrot.lane.b32.xlu1 %v1301_v41, %s3707_s27  ;;  %v1374_v52 = vsel %vm1372_vm2, %v1302_v50, 0  ;;  %v2999_v41 = vld [vmem:[%s4467_s5 + $0x18] sm:$0xff]  }
 0x352   : > { %2737 = vmatpush3.bf16.xpose.msra.mxu1 %v1314_v42  ;;  %v3000_v42 = vld [vmem:[%s4467_s5 + $0x20] sm:$0xff]  }
 0x353   : > { %2742 = vmatprep.subr.bf16.mxu1 %v3705_v4  ;;  %2763 = vmatpush3.bf16.msra.mxu0 %v2997_v39  ;;  %v3037_v39 = vld [vmem:[%s4493_s24 + $0x20] sm:$0xff]  }
 0x354   : > { %2764 = vmatprep.subr.bf16.mxu0 %v3705_v4 }
 0x355   : > { %1417 = vrot.lane.b32.xlu1 %v1300_v43, %s3707_s27 }
 0x357   : > { %2765 = vmatpush3.bf16.msra.mxu0 %v2998_v40  ;;  %v3038_v40 = vld [vmem:[%s4493_s24 + $0x68] sm:$0xff]  }
 0x358   : > { %2766 = vmatprep.subr.bf16.mxu0 %v3705_v4 }
 0x359   : > { %2739 = vmatmul.mubr.msk.bf16.vlgmr.msra.gmra.mrb[4].mxu1 %vm1309_vm1, %v1300_v43  ;;  %v3002_v43 = vld [vmem:[%s4467_s5 + $0x30] sm:$0xff]  }
 0x35a   : > { %2744 = vmatprep.mubr.msk.bf16.mxu1 %vm3706_vm0, %v3705_v4  ;;  %2743 = vmatpush3.bf16.msra.mxu1 %v1374_v52  ;;  %v2597_v52 = vld [vmem:[%s4882_s9] ss:$0 sm:$0xff] }
 0x35b   : > { %2748 = vmatprep.subr.bf16.mxu1 %v3705_v4  ;;  %2767 = vmatpush3.bf16.msra.mxu0 %v2999_v41  ;;  %v3039_v41 = vld [vmem:[%s4493_s24 + $0x28] sm:$0xff]  }
 0x35c   : > { %2768 = vmatprep.subr.bf16.mxu0 %v3705_v4 }
 0x35f   : > { %2769 = vmatpush3.bf16.msra.mxu0 %v3000_v42  ;;  %v3040_v42 = vld [vmem:[%s4493_s24 + $0x70] sm:$0xff]  }
 0x360   : > { %2770 = vmatprep.subr.bf16.mxu0 %v3705_v4 }
 0x3c3   : > { %v1421_v9 = vpop.permute.xlu1 %1420 }
 0x3c4   : > { %v1426_v11 = vsel %vm1309_vm1, %v1421_v9, 0  ;;  %v3016_v9 = vld [vmem:[%s4484_s20 + $0x40] ss:$8 sps:$4 sm:$0xff]  }
 0x3c7   : > { %v1418_v12 = vpop.permute.xlu1 %1417 }
 0x42c   : > { %v1350_v57 = vpop.f32.mrb[4].mxu1 }
 0x42d   : > { %v1351_v58 = vadd.f32 %v1350_v57, %v1307_v56  ;;  %v2740_v59 = vpop.f32.mrb[5].mxu1 }
 0x42e   : > { %v1353_v60 = vpop.f32.mrb[6].mxu1  ;;  %v3004_v59 = vld [vmem:[%s4484_s20] ss:$8 sps:$4 sm:$0xff]  }
 0x42f   : > { %v2741_v61 = vpop.f32.mrb[7].mxu1  ;;  %v1357_v62 = vsel %vm1356_vm3, %v1351_v58, -inf  ;;  %v3006_v60 = vld [vmem:[%s4484_s20 + $0x4] ss:$8 sps:$4 sm:$0xff]  }
 0x430   : > { %1358 = vmax.xlane.f32.xlu0 %v1357_v62  ;;  %v3009_v61 = vld [vmem:[%s4484_s20 + $0x14] ss:$8 sps:$4 sm:$0xff]   ;;  %v3007_v62 = vld [vmem:[%s4484_s20 + $0x10] ss:$8 sps:$4 sm:$0xff]  }
 0x4bd   : > { %v1359_v63 = vpop.xlane.xlu0 %1358 }
 0x4be   : > { %v1360_v0 = vsub.f32 %v1351_v58, %v1359_v63  ;;  %v3010_v63 = vld [vmem:[%s4484_s20 + $0x20] ss:$8 sps:$4 sm:$0xff]  }
 0x4c0   : > { %v1361_v1 = vmul.f32 1.442695, %v1360_v0 }
 0x4c2   : > { %3044 = vpow2.f32 %v1361_v1 }
 0x4cc   : > { %v3045_v2 = vpop.eup %3044 }
 0x4cd   : > { %v1363_v5 = vsel %vm1356_vm3, %v3045_v2, 0.0 }
 0x4ce   : > { %1364 = vadd.xlane.f32.xlu0 %v1363_v5 }
 0x55b   : > { %v1365_v6 = vpop.xlane.xlu0 %1364 }
 0x55c   : > { %3046 = vrcp.f32 %v1365_v6  ;;  %v3015_v6 = vld [vmem:[%s4484_s20 + $0x34] ss:$8 sps:$4 sm:$0xff]  }
 0x566   : > { %v3047_v7 = vpop.eup %3046 }
 0x567   : > { %v1367_v8 = vmul.f32 %v3047_v7, %v3045_v2  ;;  %v3013_v7 = vld [vmem:[%s4484_s20 + $0x30] ss:$8 sps:$4 sm:$0xff]  }
 0x569   : > { %v1368_v10 = vpack.c.bf16 %v1367_v8, %v1367_v8  ;;  %v3018_v8 = vld [vmem:[%s4484_s20 + $0x44] ss:$8 sps:$4 sm:$0xff]  }
 0x56b   : > { %2745 = vmatmul.mubr.msk.bf16.vlgmr.msra.gmra.mrb[8].mxu1 %vm1356_vm3, %v1368_v10  ;;  %v3021_v10 = vld [vmem:[%s4484_s20 + $0x54] ss:$8 sps:$4 sm:$0xff]  }
 0x56c   : > { %2749 = vmatpush3.bf16.xpose.msra.mxu1 %v1426_v11  ;;  %2750 = vmatprep.mubr.msk.bf16.mxu1 %vm3706_vm0, %v3705_v4  ;;  %v3019_v11 = vld [vmem:[%s4484_s20 + $0x50] ss:$8 sps:$4 sm:$0xff]  }
 0x56d   : > { %2754 = vmatprep.subr.bf16.mxu1 %v3705_v4 }
 0x573   : > { %2751 = vmatmul.mubr.msk.bf16.vlgmr.msra.gmra.mrb[12].mxu1 %vm1309_vm1, %v1418_v12  ;;  %v3024_v12 = vld [vmem:[%s4484_s20 + $0x64] ss:$8 sps:$4 sm:$0xff]  }
 0x574   : > { %2756 = vmatprep.mubr.msk.bf16.mxu1 %vm3706_vm0, %v3705_v4 }
 0x63e   : > { %v1410_v13 = vpop.f32.mrb[8].mxu1 }
 0x63f   : > { %v2746_v14 = vpop.f32.mrb[9].mxu1 }
 0x640   : > { %v1413_v15 = vpop.f32.mrb[10].mxu1  ;;  %v3027_v14 = vld [vmem:[%s4484_s20 + $0x74] ss:$8 sps:$4 sm:$0xff]  }
 0x641   : > { %v2747_v16 = vpop.f32.mrb[11].mxu1  ;;  %v3025_v15 = vld [vmem:[%s4484_s20 + $0x70] ss:$8 sps:$4 sm:$0xff]  }
 0x646   : > { %v1462_v17 = vpop.f32.mrb[12].mxu1 }
 0x647   : > { %v1463_v18 = vadd.f32 %v1462_v17, %v1307_v56  ;;  %v2752_v19 = vpop.f32.mrb[13].mxu1 }
 0x648   : > { %v1465_v20 = vpop.f32.mrb[14].mxu1 }
 0x649   : > { %v2753_v21 = vpop.f32.mrb[15].mxu1  ;;  %v1468_v22 = vsel %vm1356_vm3, %v1463_v18, -inf  ;;  %v2606_v20 = vld [vmem:[%s4883_s17] ss:$0 sm:$0xff] }
 0x64a   : > { %1469 = vmax.xlane.f32.xlu0 %v1468_v22  ;;  %v2607_v22 = vld [vmem:[%s4884_s4] ss:$0 sm:$0xff] }
 0x660   : > { %1481 = vrot.lane.b32.xlu0 %v1302_v50, %s3707_s27 }
 0x6d7   : > { %v1470_v23 = vpop.xlane.xlu0 %1469 }
 0x6d8   : > { %v1471_v24 = vsub.f32 %v1463_v18, %v1470_v23 }
 0x6da   : > { %v1472_v26 = vmul.f32 1.442695, %v1471_v24 }
 0x6db   : > { %v1482_v27 = vpop.permute.xlu0 %1481 }
 0x6dc   : > { %3048 = vpow2.f32 %v1472_v26  ;;  %v1487_v28 = vsel %vm1372_vm2, %v1482_v27, 0  ;;  %v3028_v27 = vld [vmem:[%s4493_s24 + $0x40] sm:$0xff]  }
 0x6dd   : > { %2755 = vmatpush3.bf16.msra.mxu1 %v1487_v28  ;;  %v3029_v28 = vld [vmem:[%s4493_s24] sm:$0xff]  }
 0x6de   : > { %1785 = vmatprep.subr.bf16.mxu1 %v3006_v60 }
 0x6e6   : > { %v3049_v31 = vpop.eup %3048 }
 0x6e7   : > { %v1474_v33 = vsel %vm1356_vm3, %v3049_v31, 0.0 }
 0x6e8   : > { %1475 = vadd.xlane.f32.xlu1 %v1474_v33  ;;  %v3031_v33 = vld [vmem:[%s4493_s24 + $0x8] sm:$0xff]  }
 0x775   : > { %v1476_v34 = vpop.xlane.xlu1 %1475 }
 0x776   : > { %3050 = vrcp.f32 %v1476_v34  ;;  %v3032_v34 = vld [vmem:[%s4493_s24 + $0x50] sm:$0xff]  }
 0x780   : > { %v3051_v35 = vpop.eup %3050 }
 0x781   : > { %v1478_v36 = vmul.f32 %v3051_v35, %v3049_v31  ;;  %v3030_v31 = vld [vmem:[%s4493_s24 + $0x48] sm:$0xff]   ;;  %v3033_v35 = vld [vmem:[%s4493_s24 + $0x10] sm:$0xff]  }
 0x783   : > { %v1479_v37 = vpack.c.bf16 %v1478_v36, %v1478_v36  ;;  %v3034_v36 = vld [vmem:[%s4493_s24 + $0x58] sm:$0xff]  }
 0x785   : > { %2757 = vmatmul.mubr.msk.bf16.vlgmr.msra.gmra.mrb[16].mxu1 %vm1356_vm3, %v1479_v37  ;;  %v3035_v37 = vld [vmem:[%s4493_s24 + $0x18] sm:$0xff]  }
 0x786   : > { %1817 = vmatprep.mubr.bf16.mxu1 %v3704_v3  ;;  %v3001_v3 = vld [vmem:[%s4467_s5 + $0x28] sm:$0xff]   ;;  %1786 = vmatpush1.bf16.msra.mxu1 %v3004_v59  ;;  %s4885_s5 = sld [smem:[#allocation45_spill]] }
 0x787   : > { %2771 = vmatpush3.bf16.msra.mxu0 %v3001_v3  ;;  %1787 = vmatprep.subr.bf16.mxu1 %v3009_v61  ;;  %v3041_v3 = vld [vmem:[%s4493_s24 + $0x30] sm:$0xff]  }
 0x788   : > { %2772 = vmatprep.subr.bf16.mxu0 %v3705_v4 }
 0x78a   : > { %1788 = vmatpush1.bf16.msra.mxu1 %v3007_v62 }
 0x78b   : > { %2773 = vmatpush3.bf16.msra.mxu0 %v3002_v43  ;;  %v3042_v43 = vld [vmem:[%s4493_s24 + $0x78] sm:$0xff]  }
 0x78c   : > { %2774 = vmatprep.subr.bf16.mxu0 %v3705_v4  ;;  %v1646_v4 = vunpack.c.l.bf16 %v4547_v25  ;;  %v3012_v25 = vld [vmem:[%s4484_s20 + $0x24] ss:$8 sps:$4 sm:$0xff]   ;;  %p2643_p3 = scmp.ne.s32.totalorder %s4885_s5, 1 }
 0x78d   : > { %1789 = vmatprep.subr.bf16.mxu1 %v3012_v25  ;;  %vm3709_vm4 = vmmov (!%p2643_p3), 0   ;;  %vm2160_vm5 = vcmask (!%p2643_p3), 16384  }
 0x78e   : > { %1790 = vmatpush1.bf16.msra.mxu1 %v3010_v63 }
 0x78f   : > { %2775 = vmatpush3.bf16.msra.mxu0 %v3003_v44  ;;  %1791 = vmatprep.subr.bf16.mxu1 %v3015_v6  ;;  %v3043_v44 = vld [vmem:[%s4493_s24 + $0x38] sm:$0xff]  }
 0x790   : > { %2685 = vmatprep.subr.bf16.mxu0 %v3028_v27  ;;  %v2642_v27 = vld [vmem:[%s917_s22] ss:$0 sm:$0xff] }
 0x792   : > { %1792 = vmatpush1.bf16.msra.mxu1 %v3013_v7 }
 0x793   : > { %1793 = vmatprep.subr.bf16.mxu1 %v3018_v8  ;;  %v2624_v8 = vld [vmem:[%s901_s12] ss:$0 sm:$0xff] }
 0x796   : > { %1794 = vmatpush1.bf16.msra.mxu1 %v3016_v9 }
 0x797   : > { %1795 = vmatprep.subr.bf16.mxu1 %v3021_v10 }
 0x79a   : > { %1796 = vmatpush1.bf16.msra.mxu1 %v3019_v11 }
 0x79b   : > { %1797 = vmatprep.subr.bf16.mxu1 %v3024_v12 }
 0x858   : > { %v1523_v45 = vpop.f32.mrb[16].mxu1 }
 0x859   : > { %1530 = vrot.lane.b32.xlu0 %v1523_v45, %s3707_s27  ;;  %v2758_v46 = vpop.f32.mrb[17].mxu1  ;;  %v1693_v45 = vld [vmem:[%s4487_s8] sm:$0x3] }
 0x85a   : > { %v1526_v47 = vpop.f32.mrb[18].mxu1  ;;  %v1698_v46 = vrot.slane %v1693_v45, %v4569_v32 }
 0x85b   : > { %v2759_v48 = vpop.f32.mrb[19].mxu1  ;;  %v1702_v47 = vrot.slane %v1693_v45, %v1082_v30 }
 0x8cb   : > { %v1531_v49 = vpop.permute.xlu0 %1530 }
 0x8cc   : > { %v1533_v50 = vsel %vm1309_vm1, %v1410_v13, %v1531_v49  ;;  %v3022_v13 = vld [vmem:[%s4484_s20 + $0x60] ss:$8 sps:$4 sm:$0xff]  }
 0x8cd   : > { %v1534_v51 = vpack.c.bf16 %v1533_v50, %v1533_v50  ;;  %1798 = vmatpush1.bf16.msra.mxu1 %v3022_v13 }
 0x8ce   : > { %1799 = vmatprep.subr.bf16.mxu1 %v3027_v14 }
 0x8cf   : > { %2777 = vmatmul.mubr.bf16.vlgmr.msra.gmra.mrb[4].mxu0 %v1534_v51 }
 0x8d0   : > { %2686 = vmatpush3.bf16.msra.mxu0 %v3029_v28 }
 0x8d1   : > { %1800 = vmatpush1.bf16.msra.mxu1 %v3025_v15  ;;  %2687 = vmatprep.subr.bf16.mxu0 %v3030_v31 }
 0x8d4   : > { %2688 = vmatpush3.bf16.msra.mxu0 %v3031_v33 }
 0x8d5   : > { %2689 = vmatprep.subr.bf16.mxu0 %v3032_v34  ;;  %v3708_v34 = vmov (!%p2643_p3), 0.0  }
 0x8d8   : > { %2690 = vmatpush3.bf16.msra.mxu0 %v3033_v35  ;;  %v3061_v35 = vld [vmem:[#allocation26 + $0x8] sm:$0xff] (!%p2643_p3)  }
 0x8d9   : > { %2691 = vmatprep.subr.bf16.mxu0 %v3034_v36  ;;  %v3062_v36 = vld [vmem:[#allocation26 + $0x10] sm:$0xff] (!%p2643_p3)  }
 0x8dc   : > { %2692 = vmatpush3.bf16.msra.mxu0 %v3035_v37  ;;  %v3063_v37 = vld [vmem:[#allocation26 + $0x18] sm:$0xff] (!%p2643_p3)  }
 0x8dd   : > { %2693 = vmatprep.subr.bf16.mxu0 %v3036_v38  ;;  %v3064_v38 = vld [vmem:[#allocation26 + $0x20] sm:$0xff] (!%p2643_p3)  }
 0x8e0   : > { %2694 = vmatpush3.bf16.msra.mxu0 %v3037_v39  ;;  %v3065_v39 = vld [vmem:[#allocation26 + $0x28] sm:$0xff] (!%p2643_p3)  }
 0x8e1   : > { %2695 = vmatprep.subr.bf16.mxu0 %v3038_v40  ;;  %v3066_v40 = vld [vmem:[#allocation26 + $0x30] sm:$0xff] (!%p2643_p3)  }
 0x8e4   : > { %2696 = vmatpush3.bf16.msra.mxu0 %v3039_v41  ;;  %v3067_v41 = vld [vmem:[#allocation26 + $0x38] sm:$0xff] (!%p2643_p3)  }
 0x8e5   : > { %2697 = vmatprep.subr.bf16.mxu0 %v3040_v42  ;;  %v2071_v42 = vld [vmem:[#allocation27] sm:$0x1] (!%p2643_p3) }
 0x8e8   : > { %2698 = vmatpush3.bf16.msra.mxu0 %v3041_v3 }
 0x8e9   : > { %2699 = vmatprep.subr.bf16.mxu0 %v3042_v43 }
 0x8ec   : > { %2700 = vmatpush3.bf16.msra.mxu0 %v3043_v44 }
 0x8ed   : > { %2780 = vmatprep.subr.bf16.mxu0 (!%p2643_p3), %v3708_v34 }
 0x9a2   : > { %v1640_v53 = vpop.f32.mrb[4].mxu0 }
 0x9a3   : > { %v1641_v54 = vadd.f32 %v2597_v52, %v1640_v53  ;;  %v2778_v55 = vpop.f32.mrb[5].mxu0 }
 0x9a4   : > { %v1643_v56 = vpop.f32.mrb[6].mxu0 }
 0x9a5   : > { %v2779_v57 = vpop.f32.mrb[7].mxu0  ;;  %v1647_v58 = vadd.f32 %v1646_v4, %v1641_v54 }
 0x9a7   : > { %1650 = vadd.xlane.f32.xlu0 %v1647_v58 }
 0xa34   : > { %v1651_v0 = vpop.xlane.xlu0 %1650 }
 0xa35   : > { %v1653_v1 = vmul.f32 0.0078125, %v1651_v0 }
 0xa37   : > { %v1654_v2 = vsub.f32 %v1647_v58, %v1653_v1 }
 0xa39   : > { %v1655_v5 = vmul.f32 %v1654_v2, %v1654_v2 }
 0xa3b   : > { %1656 = vadd.xlane.f32.xlu1 %v1655_v5 }
 0xac8   : > { %v1657_v16 = vpop.xlane.xlu1 %1656 }
 0xac9   : > { %v1658_v17 = vmul.f32 0.0078125, %v1657_v16 }
 0xacb   : > { %v1659_v18 = vadd.f32 1e-05, %v1658_v17 }
 0xacd   : > { %3052 = vrsqrt.f32 %v1659_v18 }
 0xad7   : > { %v3053_v19 = vpop.eup %3052 }
 0xad8   : > { %v1661_v21 = vmul.f32 %v3053_v19, %v1654_v2 }
 0xada   : > { %v1668_v23 = vmul.f32 %v2606_v20, %v1661_v21 }
 0xadc   : > { %v4643_v24 = vadd.f32 %v2607_v22, %v1668_v23  ;;  %v2641_v23 = vld [vmem:[%s909_s19] ss:$0 sm:$0xff] }
 0xade   : > { %v1676_v26 = vpack.c.bf16 %v4643_v24, %v4643_v24 }
 0xae0   : > { %1818 = vmatmul.mubr.bf16.vlgmr.msra.gmra.mrb[20].mxu1 %v1676_v26 }
 0xbb3   : > { %v1819_v48 = vpop.f32.mrb[20].mxu1 }
 0xbb4   : > { %v1820_v49 = vadd.f32 %v1819_v48, %v1698_v46  ;;  %v1821_v50 = vpop.f32.mrb[21].mxu1 }
 0xbb5   : > { %v1822_v51 = vadd.f32 %v1821_v50, %v1702_v47  ;;  %v1823_v52 = vpop.f32.mrb[22].mxu1 }
 0xbb6   : > { %v1826_v4 = vmul.f32 %v1820_v49, %v1820_v49  ;;  %v1824_v53 = vpop.f32.mrb[23].mxu1 }
 0xbb7   : > { %v1827_v54 = vmul.f32 %v1822_v51, %v1822_v51 }
 0xbb8   : > { %v1828_v55 = vmul.f32 %v1826_v4, %v1820_v49 }
 0xbb9   : > { %v1829_v56 = vmul.f32 %v1827_v54, %v1822_v51 }
 0xbba   : > { %v1830_v57 = vmul.f32 0.044715, %v1828_v55 }
 0xbbb   : > { %v1831_v58 = vmul.f32 0.044715, %v1829_v56 }
 0xbbc   : > { %v1832_v59 = vadd.f32 %v1830_v57, %v1820_v49 }
 0xbbd   : > { %v1833_v60 = vadd.f32 %v1831_v58, %v1822_v51 }
 0xbbe   : > { %v1834_v61 = vmul.f32 0.7978846, %v1832_v59 }
 0xbbf   : > { %v1835_v62 = vmul.f32 0.7978846, %v1833_v60 }
 0xbc0   : > { %3054 = vtanh.f32 %v1834_v61 }
 0xbc1   : > { %3056 = vtanh.f32 %v1835_v62 }
 0xbca   : > { %v3055_v29 = vpop.eup %3054 }
 0xbcb   : > { %v3057_v30 = vpop.eup %3056  ;;  %v1838_v32 = vadd.f32 1.0, %v3055_v29 }
 0xbcc   : > { %v1839_v25 = vadd.f32 1.0, %v3057_v30 }
 0xbcd   : > { %v1840_v63 = vmul.f32 0.5, %v1838_v32 }
 0xbce   : > { %v1841_v0 = vmul.f32 0.5, %v1839_v25 }
 0xbcf   : > { %v1842_v1 = vmul.f32 %v1840_v63, %v1820_v49 }
 0xbd0   : > { %v1843_v2 = vmul.f32 %v1841_v0, %v1822_v51 }
 0xbd1   : > { %v1844_v6 = vpack.c.bf16 %v1842_v1, %v1842_v1 }
 0xbd2   : > { %v1845_v5 = vpack.c.bf16 %v1843_v2, %v1843_v2 }
 0xbd4   : > { %2013 = vmatprep.mubr.bf16.mxu0 %v1845_v5 }
 0xbd5   : > { %2014 = vmatmul.mubr.bf16.vlgmr.msra.gmra.mrb[8].mxu0 %v1844_v6 }
 0xbd6   : > { %2796 = vmatprep.mubr.msk.bf16.mxu0 (!%p2643_p3), %vm3709_vm4, %v3708_v34 }
 0xca8   : > { %v2701_v7 = vpop.f32.mrb[8].mxu0 }
 0xca9   : > { %v2702_v9 = vpop.f32.mrb[9].mxu0 }
 0xcaa   : > { %v2703_v10 = vadd.f32 %v2702_v9, %v2701_v7  ;;  %v2704_v11 = vpop.f32.mrb[10].mxu0 }
 0xcab   : > { %v2705_v12 = vpop.f32.mrb[11].mxu0 }
 0xcac   : > { %v2016_v13 = vadd.f32 %v2703_v10, %v2624_v8 }
 0xcae   : > { %v2021_v14 = vadd.f32 %v2016_v13, %v4643_v24  ;;  %v3060_v24 = vld [vmem:[#allocation26] sm:$0xff] (!%p2643_p3)  }
 0xcaf   : > { %2781 = vmatpush3.bf16.msra.mxu0 (!%p2643_p3), %v3060_v24 }
 0xcb0   : > { %2024 = vadd.xlane.f32.xlu1 %v2021_v14  ;;  %2782 = vmatprep.subr.bf16.mxu0 (!%p2643_p3), %v3708_v34 }
 0xcb3   : > { %2783 = vmatpush3.bf16.msra.mxu0 (!%p2643_p3), %v3061_v35 }
 0xcb4   : > { %2784 = vmatprep.subr.bf16.mxu0 (!%p2643_p3), %v3708_v34 }
 0xcb7   : > { %2785 = vmatpush3.bf16.msra.mxu0 (!%p2643_p3), %v3062_v36 }
 0xcb8   : > { %2786 = vmatprep.subr.bf16.mxu0 (!%p2643_p3), %v3708_v34 }
 0xcbb   : > { %2787 = vmatpush3.bf16.msra.mxu0 (!%p2643_p3), %v3063_v37 }
 0xcbc   : > { %2788 = vmatprep.subr.bf16.mxu0 (!%p2643_p3), %v3708_v34 }
 0xcbf   : > { %2789 = vmatpush3.bf16.msra.mxu0 (!%p2643_p3), %v3064_v38 }
 0xcc0   : > { %2790 = vmatprep.subr.bf16.mxu0 (!%p2643_p3), %v3708_v34 }
 0xcc3   : > { %2791 = vmatpush3.bf16.msra.mxu0 (!%p2643_p3), %v3065_v39 }
 0xcc4   : > { %2792 = vmatprep.subr.bf16.mxu0 (!%p2643_p3), %v3708_v34 }
 0xcc7   : > { %2793 = vmatpush3.bf16.msra.mxu0 (!%p2643_p3), %v3066_v40 }
 0xcc8   : > { %2794 = vmatprep.subr.bf16.mxu0 (!%p2643_p3), %v3708_v34 }
 0xccb   : > { %2795 = vmatpush3.bf16.msra.mxu0 (!%p2643_p3), %v3067_v41 }
 0xd3d   : > { %v2025_v15 = vpop.xlane.xlu1 %2024 }
 0xd3e   : > { %v2026_v16 = vmul.f32 0.0078125, %v2025_v15 }
 0xd40   : > { %v2027_v17 = vsub.f32 %v2021_v14, %v2026_v16 }
 0xd42   : > { %v2028_v18 = vmul.f32 %v2027_v17, %v2027_v17 }
 0xd44   : > { %2029 = vadd.xlane.f32.xlu1 %v2028_v18 }
 0xdd1   : > { %v2030_v19 = vpop.xlane.xlu1 %2029 }
 0xdd2   : > { %v2031_v20 = vmul.f32 0.0078125, %v2030_v19 }
 0xdd4   : > { %v2032_v21 = vadd.f32 1e-05, %v2031_v20 }
 0xdd6   : > { %3058 = vrsqrt.f32 %v2032_v21 }
 0xde0   : > { %v3059_v22 = vpop.eup %3058 }
 0xde1   : > { %v2034_v26 = vmul.f32 %v3059_v22, %v2027_v17 }
 0xde3   : > { %v2041_v28 = vmul.f32 %v2641_v23, %v2034_v26  ;;  %2054 = sbr.rel (%p2643_p3) target bundleno = 3776 (0xec0), region = 156 }
 0xde5   : > { %v2048_v31 = vadd.f32 %v2642_v27, %v2041_v28 }
 0xde7   : > { %v2049_v33 = vpack.c.bf16 %v2048_v31, %v2048_v31 }
 0xde9   : > { %2050 = vst [vmem:[#allocation2] sm:$0xf] %v2049_v33  ;;  %2797 = vmatmul.mubr.bf16.vlgmr.msra.gmra.mrb[0].mxu0 (!%p2643_p3), %v2049_v33 }
 0xebc   : > { %v2154_v3 = vpop.f32.mrb[0].mxu0 }
 0xebd   : > { %v2155_v43 = vadd.f32 %v2154_v3, %v2071_v42  ;;  %v2798_v44 = vpop.f32.mrb[1].mxu0 }
 0xebe   : > { %v2157_v45 = vpop.f32.mrb[2].mxu0 }
 0xebf   : > { %2161 = vst.msk [vmem:[%s1030_s16] sm:$0x1] %vm2160_vm5, %v2155_v43  ;;  %v2799_v46 = vpop.f32.mrb[3].mxu0 }
 0xec0 PF: > { %s4886_s22 = sld [smem:[#allocation46_spill]]  ;;  %s4887_s25 = sld [smem:[#allocation54_spill]] }
 0xec1   : > { %s4888_s20 = sld [smem:[#allocation71_spill]]  ;;  %s2175_s8 = sshll.u32 %s1030_s16, 4  ;;  %s2176_s8 = int_to_ptr.vmem [resolvable:$true] %s2175_s8 }
 0xec2   : > { %s2163_s24 = scalar_lea.sflag [#allocation5], %s4429_s28  ;;  %s3516_s19 = scalar_lea.vmem %s2176_s8, 16 }
 0xec3   : > { %p3517_p1 = scmp.ne.s32.totalorder %s2176_s8, %s3516_s19  ;;  %s3710_s15 = smov [#allocation29]  }
 0xec4   : > { %s3520_s27 = sshll.u32 %s3710_s15, 4  ;;  %s3521_s27 = int_to_ptr.vmem [resolvable:$false] %s3520_s27 }
 0xec5   : > { %s3522_s6 = scalar_lea.vmem %s3521_s27, 32  ;;  %p3523_p0 = scmp.lt.s32.totalorder %s2176_s8, %s3521_s27 }
 0xec6   : > { %s2652_s2 = sshll.u32 %s4886_s22, 4  ;;  %p4889_p2 = scmp.ne.s32.totalorder %s4887_s25, 0 }
 0xec7   : > { %s4681_s21 = scalar_lea.hbm %s4888_s20, %s2652_s2  ;;  %p3524_p12 = scmp.lt.s32.totalorder %s3522_s6, %s3516_s19 }
 0xec8   : > { %p3518_p7 = pnand %p3517_p1, %p4889_p2 }
 0xec9   : > { %p3525_p5 = por %p3524_p12, %p3523_p0 }
 0xeca   : > { %p3519_p10 = pneg %p3518_p7 }
 0xecc   : > { %p3526_p13 = pnand %p3525_p5, %p3519_p10 }
 0xece   : > { %3529 = shalt.err (!%p3526_p13)
}
 0xecf   : > { %s3530_s28 = scalar_lea.hbm %s4681_s21, 16  ;;  %s3534_s17 = scalar_lea.hbm %s4888_s20, 32 }
 0xed0   : > { %p3531_p11 = scmp.ne.s32.totalorder %s4681_s21, %s3530_s28  ;;  %p3535_p6 = scmp.lt.u32.totalorder %s4681_s21, %s4888_s20 }
 0xed1   : > { %p3536_p9 = scmp.lt.u32.totalorder %s3534_s17, %s3530_s28  ;;  %p3538_p1 = scmp.lt.u32.totalorder %s3530_s28, %s4681_s21 }
 0xed2   : > { %p3532_p8 = pnand %p3531_p11, %p4889_p2 }
 0xed3   : > { %p3537_p3 = por %p3536_p9, %p3535_p6 }
 0xed4   : > { %p3533_p4 = pneg %p3532_p8 }
 0xed5   : > { %p3539_p7 = por %p3538_p1, %p3537_p3 }
 0xed7   : > { %p3540_p10 = pnand %p3539_p7, %p3533_p4 }
 0xed9   : > { %3543 = shalt.err (!%p3540_p10)
}
 0xeda   : > { %2842 = dma.vmem_to_hbm [thread:$0]  (%p4889_p2), %s2176_s8, 16, %s4681_s21, %s2163_s24  }
 0xedb PF: > { %s4890_s22 = sld [smem:[#allocation43_spill]]  ;;  %s4891_s2 = sld [smem:[#allocation55_spill]] }
 0xedc   : > { %p2859_p0 = scmp.ge.s32.totalorder %s3678_s0, 2 }
 0xee1   : > { %s2187_s12 = sand.u32 1, %s4890_s22   ;;  %p4892_p12 = scmp.ne.s32.totalorder %s4891_s2, 0 }
 0xee2   : > { %s2188_s18 = scalar_lea.sflag [#allocation5], %s2187_s12 }
 0xee3   : > { %p2852_p5 = pnand %p2859_p0, %p4892_p12 }
 0xee5   : > { %3633 = dma.done.wait (!%p2852_p5), %s2188_s18, 16  }
 0xee6   : > { %3635 = vsyncadd (!%p2852_p5), %s2188_s18, 4294967280  ;;  %s54_s0 = sadd.s32 1, %s3678_s0   ;;  %s4893_s21 = sld [smem:[#allocation42_spill]] }
 0xee7   : > { %p51_p13 = scmp.ge.s32.totalorder %s54_s0, 6   ;;  %s4894_s19 = sld [smem:[#allocation51_spill]] }
 0xee8   : > { %s4895_s24 = sld [smem:[#allocation44_spill]]  ;;  %s4896_s8 = sld [smem:[#allocation52_spill]] }
 0xee9   : > { %s4897_s15 = sld [smem:[#allocation48_spill]]  ;;  %s4898_s6 = sld [smem:[#allocation49_spill]] }
 0xeea   : > { %s4899_s22 = smov %s3646_s23  ;;  %s4901_s25 = smov %s3658_s26 }
 0xeeb   : > { %s4903_s27 = smov %s3670_s29  ;;  %s4904_s28 = smov %s3674_s30 }
 0xeec   :  { %53 = sbr.rel (!%p51_p13) target bundleno = 41 (0x29), region = 302 }
 0xeed   : > { %s4900_s23 = smov %s4894_s19 }
 0xeee   : > { %s4902_s26 = smov %s4896_s8 }
 0xeef   : > { %s4905_s29 = smov %s4897_s15  ;;  %s4906_s30 = smov %s4898_s6 }
 0xef3   :  { %2192 = vsyncpa [#allocation4], 1 }
 0xef4   :  { %2194 = vsyncpa [#allocation4 + $0x1], 1 }
 0xef5   :  { %2195 = vsyncpa [#allocation7], 1 }
 0xef6   :  { %2197 = vsyncpa [#allocation7 + $0x1], 1 }
 0xef7   :  { %2198 = vsyncpa [#allocation10], 1 }
 0xef8   :  { %2200 = vsyncpa [#allocation10 + $0x1], 1 }
 0xef9   :  { %2201 = vsyncpa [#allocation13], 1 }
 0xefa   :  { %2203 = vsyncpa [#allocation13 + $0x1], 1 }
 0xefb   :  { %2204 = vsyncpa [#allocation16], 1 }
 0xefc   :  { %2206 = vsyncpa [#allocation16 + $0x1], 1 }
 0xefd   :  { %2207 = vsyncpa [#allocation19], 1 }
 0xefe   :  { %2209 = vsyncpa [#allocation19 + $0x1], 1 }
 0xeff   :  { %2210 = vsyncpa [#allocation22], 1 }
 0xf00   :  { %2212 = vsyncpa [#allocation22 + $0x1], 1 }
 0xf01   :  { %2213 = vsyncpa [#allocation25], 1 }
 0xf02   :  { %2215 = vsyncpa [#allocation25 + $0x1], 1 }
 0xf03   :  { %2216 = vsyncpa [#allocation28], 1 }
 0xf04   :  { %2217 = vsyncpa [#allocation5], 1 }
 0xf05   :  { %2219 = vsyncpa [#allocation5 + $0x1], 1 }

</bundles_post_ra>
